<compile_context>
chip_gen: v7x
topology: tpu7x:2x2x1
jax: 0.10.0
libtpu: 0.0.40
codegen_flags: <defaults>
</compile_context>

<pallas_src>
import functools
import numpy as np
import jax
import jax.numpy as jnp
from jax.experimental import pallas as pl
from jax.experimental.pallas import tpu as pltpu

LANE = 128  # pad all feature dims to the 128-lane vreg width -> unmasked vst / dense MXU tiles
_VMEM = functools.partial(pl.BlockSpec, memory_space=pltpu.MemorySpace.VMEM)


# ----------------------------- Pallas kernels -----------------------------

def _bn_train(h, gamma, beta):
    """Train-mode BatchNorm1d over rows. rsqrt routes to the EUP slot (free vs VALU)."""
    mu = jnp.mean(h, axis=0, keepdims=True)
    var = jnp.mean((h - mu) ** 2, axis=0, keepdims=True)
    return (h - mu) * jax.lax.rsqrt(var + 1e-5) * gamma + beta


def _sage_relu_bn_kernel(a_ref, x_ref, wl_ref, wr_ref, b_ref, g_ref, be_ref, o_ref):
    """encoder1: SAGEConv(mean aggr) -> ReLU -> Dropout(identity) -> BatchNorm1d."""
    x = x_ref[...]
    agg = jnp.dot(a_ref[...], x, preferred_element_type=jnp.float32)
    h = (jnp.dot(agg, wl_ref[...], preferred_element_type=jnp.float32)
         + jnp.dot(x, wr_ref[...], preferred_element_type=jnp.float32)
         + b_ref[...])
    h = jnp.maximum(h, 0.0)
    o_ref[...] = _bn_train(h, g_ref[...], be_ref[...])


def _enc2_reparam_dec1_kernel(a_ref, x_ref,
                              wl2_ref, wr2_ref, b2_ref, g2_ref, be2_ref,
                              wlm_ref, wrm_ref, bm_ref,
                              wls_ref, wrs_ref, bs_ref,
                              eps_ref,
                              d1w_ref, d1b_ref, d1g_ref, d1be_ref,
                              x2_ref, mean_ref, logstd_ref, z_ref, h_ref):
    """Fused: encoder2[0] SAGE+ReLU+BN -> encoder2[3] SAGE (mean/log_std heads)
              -> reparameterize -> decoder1 Linear+ReLU+BN.  All intermediates stay in vregs."""
    x = x_ref[...]
    a = a_ref[...]

    # encoder2[0]: SAGEConv(hid -> 2*hid) + ReLU + Dropout(identity) + BN
    agg = jnp.dot(a, x, preferred_element_type=jnp.float32)
    h2 = (jnp.dot(agg, wl2_ref[...], preferred_element_type=jnp.float32)
          + jnp.dot(x, wr2_ref[...], preferred_element_type=jnp.float32)
          + b2_ref[...])
    h2 = jnp.maximum(h2, 0.0)
    x2 = _bn_train(h2, g2_ref[...], be2_ref[...])
    x2_ref[...] = x2

    # encoder2[3]: SAGEConv(2*hid -> 2*out); .chunk(2) is done at the parameter level so there is
    # no in-kernel sub-lane slicing.  The A @ x2 mean-aggregation is computed once and shared.
    agg2 = jnp.dot(a, x2, preferred_element_type=jnp.float32)
    mean = (jnp.dot(agg2, wlm_ref[...], preferred_element_type=jnp.float32)
            + jnp.dot(x2, wrm_ref[...], preferred_element_type=jnp.float32)
            + bm_ref[...])
    logstd = (jnp.dot(agg2, wls_ref[...], preferred_element_type=jnp.float32)
              + jnp.dot(x2, wrs_ref[...], preferred_element_type=jnp.float32)
              + bs_ref[...])
    mean_ref[...] = mean
    logstd_ref[...] = logstd

    # reparameterize: mean over n samples of (mean + exp(log_std)*eps_s) == mean + exp(log_std)*mean(eps)
    # eps is pre-reduced over samples in the wrapper (single [k,128] DMA instead of n_samples slabs).
    z = mean + jnp.exp(logstd) * eps_ref[...]
    z_ref[...] = z

    # decoder1: Linear(out -> hid) + ReLU + Dropout(identity) + BN
    h = jnp.dot(z, d1w_ref[...], preferred_element_type=jnp.float32) + d1b_ref[...]
    h = jnp.maximum(h, 0.0)
    h_ref[...] = _bn_train(h, d1g_ref[...], d1be_ref[...])


def _linear_kernel(x_ref, w_ref, b_ref, o_ref):
    """decoder2: plain Linear (no BN/ReLU; no dummy gamma/beta inputs)."""
    o_ref[...] = (jnp.dot(x_ref[...], w_ref[...], preferred_element_type=jnp.float32)
                  + b_ref[...])


# ----------------------------- kernel wrappers -----------------------------

def sage_relu_bn(A, x, wl, wr, b, g, be):
    n = x.shape[0]
    return pl.pallas_call(
        _sage_relu_bn_kernel,
        out_shape=jax.ShapeDtypeStruct((n, LANE), jnp.float32),
        in_specs=[_VMEM()] * 7,
        out_specs=_VMEM(),
    )(A, x, wl, wr, b, g, be)


def enc2_reparam_dec1(A, x, p, eps_mean):
    k = x.shape[0]
    out = jax.ShapeDtypeStruct((k, LANE), jnp.float32)
    return pl.pallas_call(
        _enc2_reparam_dec1_kernel,
        out_shape=(out, out, out, out, out),   # x2, mean, log_std, z, h
        in_specs=[_VMEM()] * 18,
        out_specs=(_VMEM(),) * 5,
    )(A, x,
      p["e2_wl"], p["e2_wr"], p["e2_b"], p["e2_g"], p["e2_be"],
      p["e3_wl_m"], p["e3_wr_m"], p["e3_b_m"],
      p["e3_wl_s"], p["e3_wr_s"], p["e3_b_s"],
      eps_mean,
      p["d1_w"], p["d1_b"], p["d1_g"], p["d1_be"])


def linear(x, w, b):
    n = x.shape[0]
    return pl.pallas_call(
        _linear_kernel,
        out_shape=jax.ShapeDtypeStruct((n, LANE), jnp.float32),
        in_specs=[_VMEM()] * 3,
        out_specs=_VMEM(),
    )(x, w, b)


# ----------------------------- jittable JAX glue -----------------------------

def mean_adjacency(src, dst, valid, num_nodes):
    """Dense row-normalized adjacency (masked edges ignored) so mean-aggregation == A @ X."""
    A = jnp.zeros((num_nodes, num_nodes), jnp.float32)
    A = A.at[dst, src].add(valid.astype(jnp.float32))
    deg = jnp.sum(A, axis=1, keepdims=True)
    return A / jnp.maximum(deg, 1.0)


def topk_pool(x_pad, src, dst, valid, weight_pad, ratio):
    """PyG TopKPooling: score = tanh(x@w/||w||); keep top ceil(ratio*N); scale kept rows by score.
       Edges are kept as fixed-size (remapped, masked) arrays so everything stays jittable."""
    n = x_pad.shape[0]
    k = int(np.ceil(ratio * n))
    score = jnp.tanh(x_pad @ weight_pad / (jnp.linalg.norm(weight_pad) + 1e-16))
    _, perm = jax.lax.top_k(score, k)
    x_pooled = x_pad[perm] * score[perm][:, None]
    mapping = jnp.full((n,), -1, jnp.int32).at[perm].set(jnp.arange(k, dtype=jnp.int32))
    new_src = mapping[src]
    new_dst = mapping[dst]
    new_valid = valid & (new_src >= 0) & (new_dst >= 0)
    new_src = jnp.where(new_valid, new_src, 0)
    new_dst = jnp.where(new_valid, new_dst, 0)
    return x_pooled, new_src, new_dst, new_valid, perm


def unpool(x_pooled, perm, num_nodes):
    # TODO(synk): reference unpool is shape-inconsistent when len(perm) < rows; scatter first min() rows.
    k = min(int(perm.shape[0]), int(x_pooled.shape[0]))
    out = jnp.zeros((num_nodes, x_pooled.shape[1]), x_pooled.dtype)
    return out.at[perm[:k]].set(x_pooled[:k])


def graph_laplacian_reg(z, src, dst, valid):
    """sum over (valid) edges of ||z_src - z_tgt||^2 — trivial FLOPs, kept in XLA."""
    d = z[src] - z[dst]
    return jnp.sum(jnp.sum(d * d, axis=-1) * valid.astype(z.dtype))


@functools.partial(jax.jit, static_argnames=("hid", "out_ch", "n_samples", "ratio"))
def vae_forward(params, x, edge_index, eps_key, *, hid, out_ch, n_samples, ratio):
    N, in_ch = x.shape
    E = edge_index.shape[1]
    src = edge_index[0].astype(jnp.int32)
    dst = edge_index[1].astype(jnp.int32)
    valid0 = jnp.ones((E,), jnp.bool_)

    x_pad = jnp.zeros((N, LANE), jnp.float32).at[:, :in_ch].set(x)
    A = mean_adjacency(src, dst, valid0, N)

    # ---- encode ----
    x1 = sage_relu_bn(A, x_pad, params["e1_wl"], params["e1_wr"], params["e1_b"],
                      params["e1_g"], params["e1_be"])
    x1_pooled, src1, dst1, valid1, perm1 = topk_pool(x1, src, dst, valid0, params["pool1_w"], ratio)
    k1 = x1_pooled.shape[0]
    A_p = mean_adjacency(src1, dst1, valid1, k1)

    # eps pre-reduced over samples; padded feature columns stay exactly zero.
    eps = jax.random.normal(eps_key, (n_samples, k1, out_ch), jnp.float32)
    eps_mean = jnp.zeros((k1, LANE), jnp.float32).at[:, :out_ch].set(jnp.mean(eps, axis=0))

    x2, mean_pad, logstd_pad, z_pad, h_pad = enc2_reparam_dec1(A_p, x1_pooled, params, eps_mean)

    x2_pooled, src2, dst2, valid2, perm2 = topk_pool(x2, src1, dst1, valid1, params["pool2_w"], ratio)

    # ---- graph laplacian regularization (over edge_index_pooled) ----
    laplacian_reg = graph_laplacian_reg(z_pad, src1, dst1, valid1)

    # ---- decode ----
    h_unpooled_1 = unpool(h_pad, perm2, x2.shape[0])
    h_unpooled_2 = unpool(h_unpooled_1, perm1, x1.shape[0]) + x1
    recon_pad = linear(h_unpooled_2, params["d2_w"], params["d2_b"])

    reconstruction = recon_pad[:, :in_ch]
    mean = mean_pad[:, :out_ch]
    log_std = logstd_pad[:, :out_ch]
    pooled_graph = (x1_pooled[:, :hid], jnp.stack([src1, dst1]), valid1)
    double_pooled_graph = (x2_pooled[:, :2 * hid], jnp.stack([src2, dst2]), valid2)
    return reconstruction, laplacian_reg, mean, log_std, pooled_graph, double_pooled_graph


# ----------------------------- parameter init (pre-padded to LANE) -----------------------------

def init_params(key, in_ch, hid, out_ch):
    ks = iter(jax.random.split(key, 12))

    def lin_w(fin, fout):
        lim = 1.0 / np.sqrt(fin)
        return jax.random.uniform(next(ks), (fin, fout), jnp.float32, -lim, lim)

    def pad_w(w):
        return jnp.zeros((LANE, LANE), jnp.float32).at[:w.shape[0], :w.shape[1]].set(w)

    def pad_b():
        return jnp.zeros((1, LANE), jnp.float32)

    def pad_bn():
        return jnp.ones((1, LANE), jnp.float32), jnp.zeros((1, LANE), jnp.float32)

    def pad_vec(v):
        return jnp.zeros((LANE,), jnp.float32).at[:v.shape[0]].set(v)

    p = {}
    # encoder1: SAGEConv(in, hid) + BN(hid)
    p["e1_wl"], p["e1_wr"], p["e1_b"] = pad_w(lin_w(in_ch, hid)), pad_w(lin_w(in_ch, hid)), pad_b()
    p["e1_g"], p["e1_be"] = pad_bn()
    # encoder2[0]: SAGEConv(hid, 2*hid) + BN(2*hid)
    p["e2_wl"], p["e2_wr"], p["e2_b"] = pad_w(lin_w(hid, 2 * hid)), pad_w(lin_w(hid, 2 * hid)), pad_b()
    p["e2_g"], p["e2_be"] = pad_bn()
    # encoder2[3]: SAGEConv(2*hid, 2*out) -- chunk(2, dim=-1) implemented as two weight heads
    e3_wl, e3_wr = lin_w(2 * hid, 2 * out_ch), lin_w(2 * hid, 2 * out_ch)
    p["e3_wl_m"], p["e3_wl_s"] = pad_w(e3_wl[:, :out_ch]), pad_w(e3_wl[:, out_ch:])
    p["e3_wr_m"], p["e3_wr_s"] = pad_w(e3_wr[:, :out_ch]), pad_w(e3_wr[:, out_ch:])
    p["e3_b_m"], p["e3_b_s"] = pad_b(), pad_b()
    # TopKPooling score weights
    p["pool1_w"] = pad_vec(jax.random.uniform(next(ks), (hid,), jnp.float32, -1.0, 1.0))
    p["pool2_w"] = pad_vec(jax.random.uniform(next(ks), (2 * hid,), jnp.float32, -1.0, 1.0))
    # decoder1: Linear(out, hid) + BN(hid)
    p["d1_w"], p["d1_b"] = pad_w(lin_w(out_ch, hid)), pad_b()
    p["d1_g"], p["d1_be"] = pad_bn()
    # decoder2: Linear(hid, in)
    p["d2_w"], p["d2_b"] = pad_w(lin_w(hid, in_ch)), pad_b()
    return p


# ----------------------------- demo -----------------------------

if __name__ == "__main__":
    key = jax.random.PRNGKey(0)
    k_param, k_x, k_eps = jax.random.split(key, 3)

    N, in_ch, hid, out_ch = 16, 8, 16, 8
    n_samples, ratio = 10, 0.5

    params = init_params(k_param, in_ch, hid, out_ch)
    x = jax.random.normal(k_x, (N, in_ch), jnp.float32)

    # deterministic graph: bidirectional ring + skip-2 edges -> edge_index [2, 64]
    src_l, dst_l = [], []
    for i in range(N):
        for d in (1, 2):
            src_l += [i, (i + d) % N]
            dst_l += [(i + d) % N, i]
    edge_index = jnp.asarray(np.stack([np.array(src_l, np.int32), np.array(dst_l, np.int32)]))

    (recon, lap, mean, log_std, pooled, double_pooled) = vae_forward(
        params, x, edge_index, k_eps, hid=hid, out_ch=out_ch,
        n_samples=n_samples, ratio=ratio)

    jax.block_until_ready([recon, lap, mean, log_std,
                           pooled[0], pooled[1], pooled[2],
                           double_pooled[0], double_pooled[1], double_pooled[2]])

    # host-side presentation only: drop masked-out edges of the pooled graphs (after the jit).
    ei1 = np.asarray(pooled[1])[:, np.asarray(pooled[2])]
    ei2 = np.asarray(double_pooled[1])[:, np.asarray(double_pooled[2])]
    pooled_graph = (pooled[0], ei1)
    double_pooled_graph = (double_pooled[0], ei2)

    k1 = int(np.ceil(ratio * N))
    k2 = int(np.ceil(ratio * k1))
    assert recon.shape == (N, in_ch)
    assert mean.shape == (k1, out_ch) and log_std.shape == (k1, out_ch)
    assert pooled_graph[0].shape == (k1, hid)
    assert double_pooled_graph[0].shape == (k2, 2 * hid)
    print("KERNEL_OK")
</pallas_src>

<mosaic_0001>
module attributes {stable_mosaic.version = 11 : i64} {
  func.func private @main(%arg0: i32) attributes {dimension_semantics = [#tpu.dimension_semantics<core_parallel>], iteration_bounds = array<i64: 2>, tpu.core_type = #tpu.core_type<sc_scalar_subcore>, window_params = []} {
    return
  }
}

module attributes {stable_mosaic.version = 11 : i64} {
  func.func private @main(%arg0: i32) attributes {dimension_semantics = [#tpu.dimension_semantics<core_parallel>], iteration_bounds = array<i64: 2>, tpu.core_type = #tpu.core_type<sc_scalar_subcore>, window_params = []} {
    return
  }
}

module attributes {stable_mosaic.version = 11 : i64} {
  func.func @_sage_relu_bn_kernel(%arg0: memref<16x16xf32, #tpu.memory_space<vmem>>, %arg1: memref<16x128xf32, #tpu.memory_space<vmem>>, %arg2: memref<128x128xf32, #tpu.memory_space<vmem>>, %arg3: memref<128x128xf32, #tpu.memory_space<vmem>>, %arg4: memref<1x128xf32, #tpu.memory_space<vmem>>, %arg5: memref<1x128xf32, #tpu.memory_space<vmem>>, %arg6: memref<1x128xf32, #tpu.memory_space<vmem>>, %arg7: memref<16x128xf32, #tpu.memory_space<vmem>>) attributes {dimension_semantics = [], scalar_prefetch = 0 : i64, scratch_operands = 0 : i64, tpu.core_type = #tpu.core_type<tc>} {
    %c0 = arith.constant 0 : index
    %c0_0 = arith.constant 0 : index
    %0 = vector.load %arg1[%c0, %c0_0] : memref<16x128xf32, #tpu.memory_space<vmem>>, vector<16x128xf32>
    %c0_1 = arith.constant 0 : index
    %c0_2 = arith.constant 0 : index
    %1 = vector.load %arg0[%c0_1, %c0_2] : memref<16x16xf32, #tpu.memory_space<vmem>>, vector<16x16xf32>
    %cst = arith.constant dense<0.000000e+00> : vector<16x128xf32>
    %2 = tpu.matmul %1, %0, %cst {dimension_numbers = #tpu.dot_dimension_numbers<[1], [0], [0], [1], [0, 0, 1, 1], [], []>} : vector<16x16xf32>, vector<16x128xf32>, vector<16x128xf32> -> vector<16x128xf32>
    %c0_3 = arith.constant 0 : index
    %c0_4 = arith.constant 0 : index
    %3 = vector.load %arg2[%c0_3, %c0_4] : memref<128x128xf32, #tpu.memory_space<vmem>>, vector<128x128xf32>
    %cst_5 = arith.constant dense<0.000000e+00> : vector<16x128xf32>
    %4 = tpu.matmul %2, %3, %cst_5 {dimension_numbers = #tpu.dot_dimension_numbers<[1], [0], [0], [1], [0, 0, 1, 1], [], []>} : vector<16x128xf32>, vector<128x128xf32>, vector<16x128xf32> -> vector<16x128xf32>
    %c0_6 = arith.constant 0 : index
    %c0_7 = arith.constant 0 : index
    %5 = vector.load %arg3[%c0_6, %c0_7] : memref<128x128xf32, #tpu.memory_space<vmem>>, vector<128x128xf32>
    %cst_8 = arith.constant dense<0.000000e+00> : vector<16x128xf32>
    %6 = tpu.matmul %0, %5, %cst_8 {dimension_numbers = #tpu.dot_dimension_numbers<[1], [0], [0], [1], [0, 0, 1, 1], [], []>} : vector<16x128xf32>, vector<128x128xf32>, vector<16x128xf32> -> vector<16x128xf32>
    %7 = arith.addf %4, %6 : vector<16x128xf32>
    %c0_9 = arith.constant 0 : index
    %c0_10 = arith.constant 0 : index
    %8 = vector.load %arg4[%c0_9, %c0_10] : memref<1x128xf32, #tpu.memory_space<vmem>>, vector<1x128xf32>
    %9 = vector.broadcast %8 : vector<1x128xf32> to vector<16x128xf32>
    %10 = arith.addf %7, %9 : vector<16x128xf32>
    %cst_11 = arith.constant 0.000000e+00 : f32
    %11 = vector.broadcast %cst_11 : f32 to vector<16x128xf32>
    %12 = arith.maximumf %10, %11 : vector<16x128xf32>
    %c0_12 = arith.constant 0 : index
    %c0_13 = arith.constant 0 : index
    %13 = vector.load %arg5[%c0_12, %c0_13] : memref<1x128xf32, #tpu.memory_space<vmem>>, vector<1x128xf32>
    %c0_14 = arith.constant 0 : index
    %c0_15 = arith.constant 0 : index
    %14 = vector.load %arg6[%c0_14, %c0_15] : memref<1x128xf32, #tpu.memory_space<vmem>>, vector<1x128xf32>
    %cst_16 = arith.constant dense<0.000000e+00> : vector<128xf32>
    %15 = vector.multi_reduction <add>, %12, %cst_16 [0] : vector<16x128xf32> to vector<128xf32>
    %16 = vector.shape_cast %15 : vector<128xf32> to vector<1x128xf32>
    %cst_17 = arith.constant 1.600000e+01 : f32
    %17 = vector.broadcast %cst_17 : f32 to vector<1x128xf32>
    %18 = arith.divf %16, %17 : vector<1x128xf32>
    %19 = vector.broadcast %18 : vector<1x128xf32> to vector<16x128xf32>
    %20 = arith.subf %12, %19 : vector<16x128xf32>
    %21 = arith.mulf %20, %20 : vector<16x128xf32>
    %cst_18 = arith.constant dense<0.000000e+00> : vector<128xf32>
    %22 = vector.multi_reduction <add>, %21, %cst_18 [0] : vector<16x128xf32> to vector<128xf32>
    %23 = vector.shape_cast %22 : vector<128xf32> to vector<1x128xf32>
    %cst_19 = arith.constant 1.600000e+01 : f32
    %24 = vector.broadcast %cst_19 : f32 to vector<1x128xf32>
    %25 = arith.divf %23, %24 : vector<1x128xf32>
    %26 = vector.broadcast %18 : vector<1x128xf32> to vector<16x128xf32>
    %27 = arith.subf %12, %26 : vector<16x128xf32>
    %cst_20 = arith.constant 9.99999974E-6 : f32
    %28 = vector.broadcast %cst_20 : f32 to vector<1x128xf32>
    %29 = arith.addf %25, %28 : vector<1x128xf32>
    %30 = math.rsqrt %29 : vector<1x128xf32>
    %31 = vector.broadcast %30 : vector<1x128xf32> to vector<16x128xf32>
    %32 = arith.mulf %27, %31 : vector<16x128xf32>
    %33 = vector.broadcast %13 : vector<1x128xf32> to vector<16x128xf32>
    %34 = arith.mulf %32, %33 : vector<16x128xf32>
    %35 = vector.broadcast %14 : vector<1x128xf32> to vector<16x128xf32>
    %36 = arith.addf %34, %35 : vector<16x128xf32>
    %c0_21 = arith.constant 0 : index
    %c0_22 = arith.constant 0 : index
    %37 = vector.load %arg7[%c0_21, %c0_22] : memref<16x128xf32, #tpu.memory_space<vmem>>, vector<16x128xf32>
    tpu.vector_store %arg7[%c0_21, %c0_22], %36 {strides = array<i32>} : memref<16x128xf32, #tpu.memory_space<vmem>>, vector<16x128xf32>,
    return
  }
}

module attributes {stable_mosaic.version = 11 : i64} {
  func.func @_enc2_reparam_dec1_kernel(%arg0: memref<8x8xf32, #tpu.memory_space<vmem>>, %arg1: memref<8x128xf32, #tpu.memory_space<vmem>>, %arg2: memref<128x128xf32, #tpu.memory_space<vmem>>, %arg3: memref<128x128xf32, #tpu.memory_space<vmem>>, %arg4: memref<1x128xf32, #tpu.memory_space<vmem>>, %arg5: memref<1x128xf32, #tpu.memory_space<vmem>>, %arg6: memref<1x128xf32, #tpu.memory_space<vmem>>, %arg7: memref<128x128xf32, #tpu.memory_space<vmem>>, %arg8: memref<128x128xf32, #tpu.memory_space<vmem>>, %arg9: memref<1x128xf32, #tpu.memory_space<vmem>>, %arg10: memref<128x128xf32, #tpu.memory_space<vmem>>, %arg11: memref<128x128xf32, #tpu.memory_space<vmem>>, %arg12: memref<1x128xf32, #tpu.memory_space<vmem>>, %arg13: memref<8x128xf32, #tpu.memory_space<vmem>>, %arg14: memref<128x128xf32, #tpu.memory_space<vmem>>, %arg15: memref<1x128xf32, #tpu.memory_space<vmem>>, %arg16: memref<1x128xf32, #tpu.memory_space<vmem>>, %arg17: memref<1x128xf32, #tpu.memory_space<vmem>>, %arg18: memref<8x128xf32, #tpu.memory_space<vmem>>, %arg19: memref<8x128xf32, #tpu.memory_space<vmem>>, %arg20: memref<8x128xf32, #tpu.memory_space<vmem>>, %arg21: memref<8x128xf32, #tpu.memory_space<vmem>>, %arg22: memref<8x128xf32, #tpu.memory_space<vmem>>) attributes {dimension_semantics = [], scalar_prefetch = 0 : i64, scratch_operands = 0 : i64, tpu.core_type = #tpu.core_type<tc>} {
    %c0 = arith.constant 0 : index
    %c0_0 = arith.constant 0 : index
    %0 = vector.load %arg1[%c0, %c0_0] : memref<8x128xf32, #tpu.memory_space<vmem>>, vector<8x128xf32>
    %c0_1 = arith.constant 0 : index
    %c0_2 = arith.constant 0 : index
    %1 = vector.load %arg0[%c0_1, %c0_2] : memref<8x8xf32, #tpu.memory_space<vmem>>, vector<8x8xf32>
    %cst = arith.constant dense<0.000000e+00> : vector<8x128xf32>
    %2 = tpu.matmul %1, %0, %cst {dimension_numbers = #tpu.dot_dimension_numbers<[1], [0], [0], [1], [0, 0, 1, 1], [], []>} : vector<8x8xf32>, vector<8x128xf32>, vector<8x128xf32> -> vector<8x128xf32>
    %c0_3 = arith.constant 0 : index
    %c0_4 = arith.constant 0 : index
    %3 = vector.load %arg2[%c0_3, %c0_4] : memref<128x128xf32, #tpu.memory_space<vmem>>, vector<128x128xf32>
    %cst_5 = arith.constant dense<0.000000e+00> : vector<8x128xf32>
    %4 = tpu.matmul %2, %3, %cst_5 {dimension_numbers = #tpu.dot_dimension_numbers<[1], [0], [0], [1], [0, 0, 1, 1], [], []>} : vector<8x128xf32>, vector<128x128xf32>, vector<8x128xf32> -> vector<8x128xf32>
    %c0_6 = arith.constant 0 : index
    %c0_7 = arith.constant 0 : index
    %5 = vector.load %arg3[%c0_6, %c0_7] : memref<128x128xf32, #tpu.memory_space<vmem>>, vector<128x128xf32>
    %cst_8 = arith.constant dense<0.000000e+00> : vector<8x128xf32>
    %6 = tpu.matmul %0, %5, %cst_8 {dimension_numbers = #tpu.dot_dimension_numbers<[1], [0], [0], [1], [0, 0, 1, 1], [], []>} : vector<8x128xf32>, vector<128x128xf32>, vector<8x128xf32> -> vector<8x128xf32>
    %7 = arith.addf %4, %6 : vector<8x128xf32>
    %c0_9 = arith.constant 0 : index
    %c0_10 = arith.constant 0 : index
    %8 = vector.load %arg4[%c0_9, %c0_10] : memref<1x128xf32, #tpu.memory_space<vmem>>, vector<1x128xf32>
    %9 = vector.broadcast %8 : vector<1x128xf32> to vector<8x128xf32>
    %10 = arith.addf %7, %9 : vector<8x128xf32>
    %cst_11 = arith.constant 0.000000e+00 : f32
    %11 = vector.broadcast %cst_11 : f32 to vector<8x128xf32>
    %12 = arith.maximumf %10, %11 : vector<8x128xf32>
    %c0_12 = arith.constant 0 : index
    %c0_13 = arith.constant 0 : index
    %13 = vector.load %arg5[%c0_12, %c0_13] : memref<1x128xf32, #tpu.memory_space<vmem>>, vector<1x128xf32>
    %c0_14 = arith.constant 0 : index
    %c0_15 = arith.constant 0 : index
    %14 = vector.load %arg6[%c0_14, %c0_15] : memref<1x128xf32, #tpu.memory_space<vmem>>, vector<1x128xf32>
    %cst_16 = arith.constant dense<0.000000e+00> : vector<128xf32>
    %15 = vector.multi_reduction <add>, %12, %cst_16 [0] : vector<8x128xf32> to vector<128xf32>
    %16 = vector.shape_cast %15 : vector<128xf32> to vector<1x128xf32>
    %cst_17 = arith.constant 8.000000e+00 : f32
    %17 = vector.broadcast %cst_17 : f32 to vector<1x128xf32>
    %18 = arith.divf %16, %17 : vector<1x128xf32>
    %19 = vector.broadcast %18 : vector<1x128xf32> to vector<8x128xf32>
    %20 = arith.subf %12, %19 : vector<8x128xf32>
    %21 = arith.mulf %20, %20 : vector<8x128xf32>
    %cst_18 = arith.constant dense<0.000000e+00> : vector<128xf32>
    %22 = vector.multi_reduction <add>, %21, %cst_18 [0] : vector<8x128xf32> to vector<128xf32>
    %23 = vector.shape_cast %22 : vector<128xf32> to vector<1x128xf32>
    %cst_19 = arith.constant 8.000000e+00 : f32
    %24 = vector.broadcast %cst_19 : f32 to vector<1x128xf32>
    %25 = arith.divf %23, %24 : vector<1x128xf32>
    %26 = vector.broadcast %18 : vector<1x128xf32> to vector<8x128xf32>
    %27 = arith.subf %12, %26 : vector<8x128xf32>
    %cst_20 = arith.constant 9.99999974E-6 : f32
    %28 = vector.broadcast %cst_20 : f32 to vector<1x128xf32>
    %29 = arith.addf %25, %28 : vector<1x128xf32>
    %30 = math.rsqrt %29 : vector<1x128xf32>
    %31 = vector.broadcast %30 : vector<1x128xf32> to vector<8x128xf32>
    %32 = arith.mulf %27, %31 : vector<8x128xf32>
    %33 = vector.broadcast %13 : vector<1x128xf32> to vector<8x128xf32>
    %34 = arith.mulf %32, %33 : vector<8x128xf32>
    %35 = vector.broadcast %14 : vector<1x128xf32> to vector<8x128xf32>
    %36 = arith.addf %34, %35 : vector<8x128xf32>
    %c0_21 = arith.constant 0 : index
    %c0_22 = arith.constant 0 : index
    %37 = vector.load %arg18[%c0_21, %c0_22] : memref<8x128xf32, #tpu.memory_space<vmem>>, vector<8x128xf32>
    tpu.vector_store %arg18[%c0_21, %c0_22], %36 {strides = array<i32>} : memref<8x128xf32, #tpu.memory_space<vmem>>, vector<8x128xf32>,
    %cst_23 = arith.constant dense<0.000000e+00> : vector<8x128xf32>
    %38 = tpu.matmul %1, %36, %cst_23 {dimension_numbers = #tpu.dot_dimension_numbers<[1], [0], [0], [1], [0, 0, 1, 1], [], []>} : vector<8x8xf32>, vector<8x128xf32>, vector<8x128xf32> -> vector<8x128xf32>
    %c0_24 = arith.constant 0 : index
    %c0_25 = arith.constant 0 : index
    %39 = vector.load %arg7[%c0_24, %c0_25] : memref<128x128xf32, #tpu.memory_space<vmem>>, vector<128x128xf32>
    %cst_26 = arith.constant dense<0.000000e+00> : vector<8x128xf32>
    %40 = tpu.matmul %38, %39, %cst_26 {dimension_numbers = #tpu.dot_dimension_numbers<[1], [0], [0], [1], [0, 0, 1, 1], [], []>} : vector<8x128xf32>, vector<128x128xf32>, vector<8x128xf32> -> vector<8x128xf32>
    %c0_27 = arith.constant 0 : index
    %c0_28 = arith.constant 0 : index
    %41 = vector.load %arg8[%c0_27, %c0_28] : memref<128x128xf32, #tpu.memory_space<vmem>>, vector<128x128xf32>
    %cst_29 = arith.constant dense<0.000000e+00> : vector<8x128xf32>
    %42 = tpu.matmul %36, %41, %cst_29 {dimension_numbers = #tpu.dot_dimension_numbers<[1], [0], [0], [1], [0, 0, 1, 1], [], []>} : vector<8x128xf32>, vector<128x128xf32>, vector<8x128xf32> -> vector<8x128xf32>
    %43 = arith.addf %40, %42 : vector<8x128xf32>
    %c0_30 = arith.constant 0 : index
    %c0_31 = arith.constant 0 : index
    %44 = vector.load %arg9[%c0_30, %c0_31] : memref<1x128xf32, #tpu.memory_space<vmem>>, vector<1x128xf32>
    %45 = vector.broadcast %44 : vector<1x128xf32> to vector<8x128xf32>
    %46 = arith.addf %43, %45 : vector<8x128xf32>
    %c0_32 = arith.constant 0 : index
    %c0_33 = arith.constant 0 : index
    %47 = vector.load %arg10[%c0_32, %c0_33] : memref<128x128xf32, #tpu.memory_space<vmem>>, vector<128x128xf32>
    %cst_34 = arith.constant dense<0.000000e+00> : vector<8x128xf32>
    %48 = tpu.matmul %38, %47, %cst_34 {dimension_numbers = #tpu.dot_dimension_numbers<[1], [0], [0], [1], [0, 0, 1, 1], [], []>} : vector<8x128xf32>, vector<128x128xf32>, vector<8x128xf32> -> vector<8x128xf32>
    %c0_35 = arith.constant 0 : index
    %c0_36 = arith.constant 0 : index
    %49 = vector.load %arg11[%c0_35, %c0_36] : memref<128x128xf32, #tpu.memory_space<vmem>>, vector<128x128xf32>
    %cst_37 = arith.constant dense<0.000000e+00> : vector<8x128xf32>
    %50 = tpu.matmul %36, %49, %cst_37 {dimension_numbers = #tpu.dot_dimension_numbers<[1], [0], [0], [1], [0, 0, 1, 1], [], []>} : vector<8x128xf32>, vector<128x128xf32>, vector<8x128xf32> -> vector<8x128xf32>
    %51 = arith.addf %48, %50 : vector<8x128xf32>
    %c0_38 = arith.constant 0 : index
    %c0_39 = arith.constant 0 : index
    %52 = vector.load %arg12[%c0_38, %c0_39] : memref<1x128xf32, #tpu.memory_space<vmem>>, vector<1x128xf32>
    %53 = vector.broadcast %52 : vector<1x128xf32> to vector<8x128xf32>
    %54 = arith.addf %51, %53 : vector<8x128xf32>
    %c0_40 = arith.constant 0 : index
    %c0_41 = arith.constant 0 : index
    %55 = vector.load %arg19[%c0_40, %c0_41] : memref<8x128xf32, #tpu.memory_space<vmem>>, vector<8x128xf32>
    tpu.vector_store %arg19[%c0_40, %c0_41], %46 {strides = array<i32>} : memref<8x128xf32, #tpu.memory_space<vmem>>, vector<8x128xf32>,
    %c0_42 = arith.constant 0 : index
    %c0_43 = arith.constant 0 : index
    %56 = vector.load %arg20[%c0_42, %c0_43] : memref<8x128xf32, #tpu.memory_space<vmem>>, vector<8x128xf32>
    tpu.vector_store %arg20[%c0_42, %c0_43], %54 {strides = array<i32>} : memref<8x128xf32, #tpu.memory_space<vmem>>, vector<8x128xf32>,
    %57 = math.exp %54 : vector<8x128xf32>
    %c0_44 = arith.constant 0 : index
    %c0_45 = arith.constant 0 : index
    %58 = vector.load %arg13[%c0_44, %c0_45] : memref<8x128xf32, #tpu.memory_space<vmem>>, vector<8x128xf32>
    %59 = arith.mulf %57, %58 : vector<8x128xf32>
    %60 = arith.addf %46, %59 : vector<8x128xf32>
    %c0_46 = arith.constant 0 : index
    %c0_47 = arith.constant 0 : index
    %61 = vector.load %arg21[%c0_46, %c0_47] : memref<8x128xf32, #tpu.memory_space<vmem>>, vector<8x128xf32>
    tpu.vector_store %arg21[%c0_46, %c0_47], %60 {strides = array<i32>} : memref<8x128xf32, #tpu.memory_space<vmem>>, vector<8x128xf32>,
    %c0_48 = arith.constant 0 : index
    %c0_49 = arith.constant 0 : index
    %62 = vector.load %arg14[%c0_48, %c0_49] : memref<128x128xf32, #tpu.memory_space<vmem>>, vector<128x128xf32>
    %cst_50 = arith.constant dense<0.000000e+00> : vector<8x128xf32>
    %63 = tpu.matmul %60, %62, %cst_50 {dimension_numbers = #tpu.dot_dimension_numbers<[1], [0], [0], [1], [0, 0, 1, 1], [], []>} : vector<8x128xf32>, vector<128x128xf32>, vector<8x128xf32> -> vector<8x128xf32>
    %c0_51 = arith.constant 0 : index
    %c0_52 = arith.constant 0 : index
    %64 = vector.load %arg15[%c0_51, %c0_52] : memref<1x128xf32, #tpu.memory_space<vmem>>, vector<1x128xf32>
    %65 = vector.broadcast %64 : vector<1x128xf32> to vector<8x128xf32>
    %66 = arith.addf %63, %65 : vector<8x128xf32>
    %cst_53 = arith.constant 0.000000e+00 : f32
    %67 = vector.broadcast %cst_53 : f32 to vector<8x128xf32>
    %68 = arith.maximumf %66, %67 : vector<8x128xf32>
    %c0_54 = arith.constant 0 : index
    %c0_55 = arith.constant 0 : index
    %69 = vector.load %arg16[%c0_54, %c0_55] : memref<1x128xf32, #tpu.memory_space<vmem>>, vector<1x128xf32>
    %c0_56 = arith.constant 0 : index
    %c0_57 = arith.constant 0 : index
    %70 = vector.load %arg17[%c0_56, %c0_57] : memref<1x128xf32, #tpu.memory_space<vmem>>, vector<1x128xf32>
    %cst_58 = arith.constant dense<0.000000e+00> : vector<128xf32>
    %71 = vector.multi_reduction <add>, %68, %cst_58 [0] : vector<8x128xf32> to vector<128xf32>
    %72 = vector.shape_cast %71 : vector<128xf32> to vector<1x128xf32>
    %cst_59 = arith.constant 8.000000e+00 : f32
    %73 = vector.broadcast %cst_59 : f32 to vector<1x128xf32>
    %74 = arith.divf %72, %73 : vector<1x128xf32>
    %75 = vector.broadcast %74 : vector<1x128xf32> to vector<8x128xf32>
    %76 = arith.subf %68, %75 : vector<8x128xf32>
    %77 = arith.mulf %76, %76 : vector<8x128xf32>
    %cst_60 = arith.constant dense<0.000000e+00> : vector<128xf32>
    %78 = vector.multi_reduction <add>, %77, %cst_60 [0] : vector<8x128xf32> to vector<128xf32>
    %79 = vector.shape_cast %78 : vector<128xf32> to vector<1x128xf32>
    %cst_61 = arith.constant 8.000000e+00 : f32
    %80 = vector.broadcast %cst_61 : f32 to vector<1x128xf32>
    %81 = arith.divf %79, %80 : vector<1x128xf32>
    %82 = vector.broadcast %74 : vector<1x128xf32> to vector<8x128xf32>
    %83 = arith.subf %68, %82 : vector<8x128xf32>
    %cst_62 = arith.constant 9.99999974E-6 : f32
    %84 = vector.broadcast %cst_62 : f32 to vector<1x128xf32>
    %85 = arith.addf %81, %84 : vector<1x128xf32>
    %86 = math.rsqrt %85 : vector<1x128xf32>
    %87 = vector.broadcast %86 : vector<1x128xf32> to vector<8x128xf32>
    %88 = arith.mulf %83, %87 : vector<8x128xf32>
    %89 = vector.broadcast %69 : vector<1x128xf32> to vector<8x128xf32>
    %90 = arith.mulf %88, %89 : vector<8x128xf32>
    %91 = vector.broadcast %70 : vector<1x128xf32> to vector<8x128xf32>
    %92 = arith.addf %90, %91 : vector<8x128xf32>
    %c0_63 = arith.constant 0 : index
    %c0_64 = arith.constant 0 : index
    %93 = vector.load %arg22[%c0_63, %c0_64] : memref<8x128xf32, #tpu.memory_space<vmem>>, vector<8x128xf32>
    tpu.vector_store %arg22[%c0_63, %c0_64], %92 {strides = array<i32>} : memref<8x128xf32, #tpu.memory_space<vmem>>, vector<8x128xf32>,
    return
  }
}

module attributes {stable_mosaic.version = 11 : i64} {
  func.func @_linear_kernel(%arg0: memref<16x128xf32, #tpu.memory_space<vmem>>, %arg1: memref<128x128xf32, #tpu.memory_space<vmem>>, %arg2: memref<1x128xf32, #tpu.memory_space<vmem>>, %arg3: memref<16x128xf32, #tpu.memory_space<vmem>>) attributes {dimension_semantics = [], scalar_prefetch = 0 : i64, scratch_operands = 0 : i64, tpu.core_type = #tpu.core_type<tc>} {
    %c0 = arith.constant 0 : index
    %c0_0 = arith.constant 0 : index
    %0 = vector.load %arg0[%c0, %c0_0] : memref<16x128xf32, #tpu.memory_space<vmem>>, vector<16x128xf32>
    %c0_1 = arith.constant 0 : index
    %c0_2 = arith.constant 0 : index
    %1 = vector.load %arg1[%c0_1, %c0_2] : memref<128x128xf32, #tpu.memory_space<vmem>>, vector<128x128xf32>
    %cst = arith.constant dense<0.000000e+00> : vector<16x128xf32>
    %2 = tpu.matmul %0, %1, %cst {dimension_numbers = #tpu.dot_dimension_numbers<[1], [0], [0], [1], [0, 0, 1, 1], [], []>} : vector<16x128xf32>, vector<128x128xf32>, vector<16x128xf32> -> vector<16x128xf32>
    %c0_3 = arith.constant 0 : index
    %c0_4 = arith.constant 0 : index
    %3 = vector.load %arg2[%c0_3, %c0_4] : memref<1x128xf32, #tpu.memory_space<vmem>>, vector<1x128xf32>
    %4 = vector.broadcast %3 : vector<1x128xf32> to vector<16x128xf32>
    %5 = arith.addf %2, %4 : vector<16x128xf32>
    %c0_5 = arith.constant 0 : index
    %c0_6 = arith.constant 0 : index
    %6 = vector.load %arg3[%c0_5, %c0_6] : memref<16x128xf32, #tpu.memory_space<vmem>>, vector<16x128xf32>
    tpu.vector_store %arg3[%c0_5, %c0_6], %5 {strides = array<i32>} : memref<16x128xf32, #tpu.memory_space<vmem>>, vector<16x128xf32>,
    return
  }
}

</mosaic_0001>

<bundles_post_ra>
// kernel: vae_forward.3
= control target key start
LH: loop header
LB: loop body
LE: loop exit
PB: predicated region body
PF: predicated region fallthrough
CT: control target
= control target key end

     0   :  { %vm30_vm0 = vcmask 130048   ;;  %s717_s1 = inlined_call_operand.vmem [shape: f32[16,128], index: 1, kind: input, shape index: {}]   ;;  %s718_s0 = inlined_call_operand.vmem [shape: f32[16,16], index: 0, kind: input, shape index: {}]   ;;  %s719_s3 = inlined_call_operand.vmem [shape: f32[128,128], index: 3, kind: input, shape index: {}]   ;;  %s720_s2 = inlined_call_operand.vmem [shape: f32[128,128], index: 2, kind: input, shape index: {}]   ;;  %s721_s4 = inlined_call_operand.vmem [shape: f32[1,128], index: 4, kind: input, shape index: {}]   ;;  %s722_s5 = inlined_call_operand.vmem [shape: f32[1,128], index: 5, kind: input, shape index: {}]   ;;  %s723_s6 = inlined_call_operand.vmem [shape: f32[1,128], index: 6, kind: input, shape index: {}]   ;;  %s724_s7 = inlined_call_operand.vmem [shape: f32[16,128], index: 7, kind: output, shape index: {}]  }
   0x1   :  { %v26_v0 = vld [vmem:[%s717_s1] sm:$0xff]  ;;  %v594_v1 = vld [vmem:[%s717_s1 + $0x8] sm:$0xff]  ;;  %v130_v9 = vld [vmem:[%s719_s3 + $0x10] sm:$0xff] }
   0x2   :  { %v28_v2 = vld [vmem:[%s718_s0] sm:$0xff]  ;;  %v476_v3 = vpack.c.bf16 %v594_v1, %v26_v0  ;;  %v129_v5 = vld [vmem:[%s719_s3 + $0x8] sm:$0xff]  ;;  %v131_v11 = vld [vmem:[%s719_s3 + $0x18] sm:$0xff] }
   0x3   :  { %403 = vmatprep.mubr.msk.f32.mxu0 %vm30_vm0, %v28_v2  ;;  %v128_v4 = vld [vmem:[%s719_s3] sm:$0xff]  ;;  %v113_v8 = vld [vmem:[%s720_s2 + $0x8] sm:$0xff]  ;;  %v114_v12 = vld [vmem:[%s720_s2 + $0x10] sm:$0xff]  ;;  %v484_v17 = vpack.c.bf16 %v131_v11, %v130_v9 }
   0x4   :  { %v480_v6 = vpack.c.bf16 %v129_v5, %v128_v4  ;;  %v112_v7 = vld [vmem:[%s720_s2] sm:$0xff]  ;;  %477 = vmatprep.subr.bf16.mxu0 %v476_v3  ;;  %v115_v13 = vld [vmem:[%s720_s2 + $0x18] sm:$0xff]  ;;  %v29_v14 = vld [vmem:[%s718_s0 + $0x8] sm:$0xff] }
   0x5   :  { %v512_v10 = vpack.c.bf16 %v113_v8, %v112_v7  ;;  %479 = vmatpush3.bf16.msra.mxu0 %v476_v3  ;;  %v516_v15 = vpack.c.bf16 %v115_v13, %v114_v12  ;;  %v116_v16 = vld [vmem:[%s720_s2 + $0x20] sm:$0xff]  ;;  %v117_v18 = vld [vmem:[%s720_s2 + $0x28] sm:$0xff]  ;;  %v118_v22 = vld [vmem:[%s720_s2 + $0x30] sm:$0xff] }
   0x6   :  { %481 = vmatprep.subr.bf16.mxu0 %v480_v6  ;;  %v132_v19 = vld [vmem:[%s719_s3 + $0x20] sm:$0xff]  ;;  %v133_v20 = vld [vmem:[%s719_s3 + $0x28] sm:$0xff]  ;;  %v520_v21 = vpack.c.bf16 %v117_v18, %v116_v16  ;;  %v119_v23 = vld [vmem:[%s720_s2 + $0x38] sm:$0xff] }
   0x7   :  { %513 = vmatprep.subr.bf16.mxu1 %v512_v10  ;;  %v488_v24 = vpack.c.bf16 %v133_v20, %v132_v19  ;;  %v134_v25 = vld [vmem:[%s719_s3 + $0x30] sm:$0xff]  ;;  %v135_v26 = vld [vmem:[%s719_s3 + $0x38] sm:$0xff]  ;;  %v524_v27 = vpack.c.bf16 %v119_v23, %v118_v22  ;;  %v120_v28 = vld [vmem:[%s720_s2 + $0x40] sm:$0xff] }
   0x8   :  { %515 = vmatpush3.bf16.msra.mxu1 %v512_v10  ;;  %404 = vmatmul.mubr.msk.f32.vlgmr.msra.gmra.mrb[0].mxu0 %vm30_vm0, %v29_v14  ;;  %v121_v29 = vld [vmem:[%s720_s2 + $0x48] sm:$0xff]  ;;  %v492_v30 = vpack.c.bf16 %v135_v26, %v134_v25  ;;  %v136_v31 = vld [vmem:[%s719_s3 + $0x40] sm:$0xff]  ;;  %v122_v34 = vld [vmem:[%s720_s2 + $0x50] sm:$0xff] }
   0x9   :  { %517 = vmatprep.subr.bf16.mxu1 %v516_v15  ;;  %483 = vmatpush3.bf16.msra.mxu0 %v480_v6  ;;  %v137_v32 = vld [vmem:[%s719_s3 + $0x48] sm:$0xff]  ;;  %v528_v33 = vpack.c.bf16 %v121_v29, %v120_v28  ;;  %v123_v35 = vld [vmem:[%s720_s2 + $0x58] sm:$0xff]  ;;  %v138_v37 = vld [vmem:[%s719_s3 + $0x50] sm:$0xff] }
   0xa   :  { %438 = vmatprep.mubr.f32.mxu0 %v26_v0  ;;  %485 = vmatprep.subr.bf16.mxu0 %v484_v17  ;;  %v496_v36 = vpack.c.bf16 %v137_v32, %v136_v31  ;;  %v139_v38 = vld [vmem:[%s719_s3 + $0x58] sm:$0xff]  ;;  %v532_v39 = vpack.c.bf16 %v123_v35, %v122_v34  ;;  %v124_v40 = vld [vmem:[%s720_s2 + $0x60] sm:$0xff]  ;;  %v125_v41 = vld [vmem:[%s720_s2 + $0x68] sm:$0xff] }
   0xb   :  { %v500_v42 = vpack.c.bf16 %v139_v38, %v138_v37  ;;  %v140_v43 = vld [vmem:[%s719_s3 + $0x60] sm:$0xff]  ;;  %v141_v44 = vld [vmem:[%s719_s3 + $0x68] sm:$0xff]  ;;  %v536_v45 = vpack.c.bf16 %v125_v41, %v124_v40  ;;  %v126_v46 = vld [vmem:[%s720_s2 + $0x70] sm:$0xff] }
   0xc   :  { %519 = vmatpush3.bf16.msra.mxu1 %v516_v15  ;;  %v127_v47 = vld [vmem:[%s720_s2 + $0x78] sm:$0xff]  ;;  %v504_v48 = vpack.c.bf16 %v141_v44, %v140_v43  ;;  %v142_v49 = vld [vmem:[%s719_s3 + $0x70] sm:$0xff]  ;;  %v356_v58 = vld [vmem:[%s721_s4] ss:$0 sm:$0xff] }
   0xd   :  { %521 = vmatprep.subr.bf16.mxu1 %v520_v21  ;;  %487 = vmatpush3.bf16.msra.mxu0 %v484_v17  ;;  %v143_v50 = vld [vmem:[%s719_s3 + $0x78] sm:$0xff]  ;;  %v540_v51 = vpack.c.bf16 %v127_v47, %v126_v46 }
   0xe   :  { %489 = vmatprep.subr.bf16.mxu0 %v488_v24  ;;  %v508_v52 = vpack.c.bf16 %v143_v50, %v142_v49 }
  0x10   :  { %523 = vmatpush3.bf16.msra.mxu1 %v520_v21 }
  0x11   :  { %525 = vmatprep.subr.bf16.mxu1 %v524_v27  ;;  %491 = vmatpush3.bf16.msra.mxu0 %v488_v24  ;;  %v357_v24 = vld [vmem:[%s722_s5] ss:$0 sm:$0xff] }
  0x12   :  { %493 = vmatprep.subr.bf16.mxu0 %v492_v30 }
  0x14   :  { %527 = vmatpush3.bf16.msra.mxu1 %v524_v27  ;;  %v358_v27 = vld [vmem:[%s723_s6] ss:$0 sm:$0xff] }
  0x15   :  { %529 = vmatprep.subr.bf16.mxu1 %v528_v33  ;;  %495 = vmatpush3.bf16.msra.mxu0 %v492_v30 }
  0x16   :  { %497 = vmatprep.subr.bf16.mxu0 %v496_v36 }
  0x18   :  { %531 = vmatpush3.bf16.msra.mxu1 %v528_v33 }
  0x19   :  { %533 = vmatprep.subr.bf16.mxu1 %v532_v39  ;;  %499 = vmatpush3.bf16.msra.mxu0 %v496_v36 }
  0x1a   :  { %501 = vmatprep.subr.bf16.mxu0 %v500_v42 }
  0x1c   :  { %535 = vmatpush3.bf16.msra.mxu1 %v532_v39 }
  0x1d   :  { %537 = vmatprep.subr.bf16.mxu1 %v536_v45  ;;  %503 = vmatpush3.bf16.msra.mxu0 %v500_v42 }
  0x1e   :  { %505 = vmatprep.subr.bf16.mxu0 %v504_v48 }
  0x20   :  { %539 = vmatpush3.bf16.msra.mxu1 %v536_v45 }
  0x21   :  { %541 = vmatprep.subr.bf16.mxu1 %v540_v51  ;;  %507 = vmatpush3.bf16.msra.mxu0 %v504_v48 }
  0x22   :  { %509 = vmatprep.subr.bf16.mxu0 %v508_v52 }
  0x24   :  { %543 = vmatpush3.bf16.msra.mxu1 %v540_v51 }
  0x25   :  { %511 = vmatpush3.bf16.msra.mxu0 %v508_v52 }
  0x28   :  { %439 = vmatmul.mubr.f32.vlgmr.msra.gmra.mrb[2].mxu0 %v594_v1 }
  0xdb   :  { %v405_v53 = vpop.f32.mrb[0].mxu0 }
  0xdc   :  { %v103_v54 = vpop.f32.mrb[1].mxu0 }
  0xdd   :  { %473 = vmatprep.mubr.f32.mxu1 %v103_v54 }
  0xde   :  { %474 = vmatmul.mubr.f32.vlgmr.msra.gmra.mrb[0].mxu1 %v405_v53 }
  0xfb   :  { %v440_v55 = vpop.f32.mrb[2].mxu0 }
  0xfc   :  { %v210_v56 = vpop.f32.mrb[3].mxu0 }
 0x1b1   :  { %v475_v57 = vpop.f32.mrb[0].mxu1 }
 0x1b2   :  { %v291_v59 = vadd.f32 %v475_v57, %v440_v55  ;;  %v285_v60 = vpop.f32.mrb[1].mxu1 }
 0x1b3   :  { %v286_v61 = vadd.f32 %v285_v60, %v210_v56 }
 0x1b4   :  { %v302_v62 = vadd.f32 %v356_v58, %v291_v59 }
 0x1b5   :  { %v301_v63 = vadd.f32 %v356_v58, %v286_v61 }
 0x1b6   :  { %v304_v0 = vmax.f32 %v302_v62, 0.0 }
 0x1b7   :  { %v303_v2 = vmax.f32 %v301_v63, 0.0 }
 0x1b9   :  { %v307_v3 = vadd.f32 %v304_v0, %v303_v2 }
 0x1bb   :  { %v308_v1 = vrot.slane %v307_v3, 4 }
 0x1bd   :  { %v309_v4 = vadd.f32 %v308_v1, %v307_v3 }
 0x1bf   :  { %v310_v5 = vrot.slane %v309_v4, 2 }
 0x1c1   :  { %v311_v6 = vadd.f32 %v310_v5, %v309_v4 }
 0x1c3   :  { %v312_v7 = vrot.slane %v311_v6, 1 }
 0x1c5   :  { %v313_v8 = vadd.f32 %v312_v7, %v311_v6 }
 0x1c7   :  { %v315_v9 = vmul.f32 0.0625, %v313_v8 }
 0x1c9   :  { %v316_v10 = vsub.f32 %v303_v2, %v315_v9  ;;  %v317_v11 = vsub.f32 %v304_v0, %v315_v9 }
 0x1cb   :  { %v318_v12 = vmul.f32 %v316_v10, %v316_v10  ;;  %v319_v13 = vmul.f32 %v317_v11, %v317_v11 }
 0x1cd   :  { %v320_v14 = vadd.f32 %v319_v13, %v318_v12 }
 0x1cf   :  { %v321_v15 = vrot.slane %v320_v14, 4 }
 0x1d1   :  { %v322_v16 = vadd.f32 %v321_v15, %v320_v14 }
 0x1d3   :  { %v323_v17 = vrot.slane %v322_v16, 2 }
 0x1d5   :  { %v324_v18 = vadd.f32 %v323_v17, %v322_v16 }
 0x1d7   :  { %v325_v19 = vrot.slane %v324_v18, 1 }
 0x1d9   :  { %v326_v20 = vadd.f32 %v325_v19, %v324_v18 }
 0x1db   :  { %v327_v21 = vmul.f32 0.0625, %v326_v20 }
 0x1dd   :  { %v328_v22 = vadd.f32 1e-05, %v327_v21 }
 0x1df   :  { %546 = vrsqrt.f32 %v328_v22 }
 0x1e9   :  { %v547_v23 = vpop.eup %546 }
 0x1ea   :  { %v330_v25 = vmul.f32 %v547_v23, %v316_v10  ;;  %v331_v26 = vmul.f32 %v547_v23, %v317_v11 }
 0x1ec   :  { %v338_v28 = vmul.f32 %v357_v24, %v330_v25  ;;  %v339_v29 = vmul.f32 %v357_v24, %v331_v26 }
 0x1ee   :  { %v346_v30 = vadd.f32 %v358_v27, %v338_v28  ;;  %v347_v31 = vadd.f32 %v358_v27, %v339_v29 }
 0x1f0   :  { %348 = vst [vmem:[%s724_s7] sm:$0xff] %v346_v30  ;;  %349 = vst [vmem:[%s724_s7 + $0x8] sm:$0xff] %v347_v31 }

// kernel: vae_forward.4
= control target key start
LH: loop header
LB: loop body
LE: loop exit
PB: predicated region body
PF: predicated region fallthrough
CT: control target
= control target key end

     0   :  { %s2200_s0 = inlined_call_operand.vmem [shape: f32[8,8], index: 0, kind: input, shape index: {}]   ;;  %s2201_s1 = inlined_call_operand.vmem [shape: f32[8,128], index: 1, kind: input, shape index: {}]   ;;  %s2202_s2 = inlined_call_operand.vmem [shape: f32[128,128], index: 2, kind: input, shape index: {}]   ;;  %s2203_s3 = inlined_call_operand.vmem [shape: f32[128,128], index: 3, kind: input, shape index: {}]   ;;  %s2204_s4 = inlined_call_operand.vmem [shape: f32[1,128], index: 4, kind: input, shape index: {}]   ;;  %s2205_s5 = inlined_call_operand.vmem [shape: f32[1,128], index: 5, kind: input, shape index: {}]   ;;  %s2206_s6 = inlined_call_operand.vmem [shape: f32[1,128], index: 6, kind: input, shape index: {}]   ;;  %s2207_s7 = inlined_call_operand.vmem [shape: f32[128,128], index: 7, kind: input, shape index: {}]   ;;  %s2208_s8 = inlined_call_operand.vmem [shape: f32[128,128], index: 8, kind: input, shape index: {}]   ;;  %s2209_s9 = inlined_call_operand.vmem [shape: f32[1,128], index: 9, kind: input, shape index: {}]   ;;  %s2210_s10 = inlined_call_operand.vmem [shape: f32[128,128], index: 10, kind: input, shape index: {}]   ;;  %s2211_s11 = inlined_call_operand.vmem [shape: f32[128,128], index: 11, kind: input, shape index: {}]   ;;  %s2212_s12 = inlined_call_operand.vmem [shape: f32[1,128], index: 12, kind: input, shape index: {}]   ;;  %s2213_s13 = inlined_call_operand.vmem [shape: f32[8,128], index: 13, kind: input, shape index: {}]   ;;  %s2214_s14 = inlined_call_operand.vmem [shape: f32[128,128], index: 14, kind: input, shape index: {}]   ;;  %s2215_s15 = inlined_call_operand.vmem [shape: f32[1,128], index: 15, kind: input, shape index: {}]   ;;  %s2216_s16 = inlined_call_operand.vmem [shape: f32[1,128], index: 16, kind: input, shape index: {}]   ;;  %s2217_s17 = inlined_call_operand.vmem [shape: f32[1,128], index: 17, kind: input, shape index: {}]   ;;  %s2218_s18 = inlined_call_operand.vmem [shape: f32[8,128], index: 18, kind: output, shape index: {0}]   ;;  %s2219_s19 = inlined_call_operand.hbm [shape: f32[8,128], index: 19, kind: output, shape index: {1}]   ;;  %s2220_s20 = inlined_call_operand.hbm [shape: f32[8,128], index: 20, kind: output, shape index: {2}]   ;;  %s2221_s21 = inlined_call_operand.vmem [shape: f32[8,128], index: 21, kind: output, shape index: {3}]   ;;  %s2222_s22 = inlined_call_operand.vmem [shape: f32[8,128], index: 22, kind: output, shape index: {4}]  }
   0x1   :  { %2225 = sst [smem:[#allocation8_spill]] %s2200_s0 }
   0x2   :  { %2226 = sst [smem:[#allocation9_spill]] %s2201_s1 }
   0x3   :  { %2227 = sst [smem:[#allocation10_spill]] %s2202_s2 }
   0x4   :  { %2228 = sst [smem:[#allocation11_spill]] %s2203_s3 }
   0x5   :  { %2229 = sst [smem:[#allocation12_spill]] %s2204_s4 }
   0x6   :  { %2230 = sst [smem:[#allocation13_spill]] %s2205_s5 }
   0x7   :  { %2231 = sst [smem:[#allocation14_spill]] %s2206_s6 }
   0x8   :  { %28 = vsyncpa [#allocation3], 0  ;;  %s2232_s29 = sld [smem:[#allocation9_spill]]  ;;  %s2233_s0 = sld [smem:[#allocation8_spill]]  ;;  %vm68_vm0 = vcmask 64512   ;;  %v1583_v2 = vmov 0.0  }
   0x9   :  { %1101 = vmatprep.subr.mxu1 %v1583_v2  ;;  %vm1584_vm1 = vmmov 0   ;;  %s2234_s5 = sld [smem:[#allocation11_spill]]  ;;  %s2235_s2 = sld [smem:[#allocation10_spill]]  ;;  %v1585_v7 = vmov 0.0|0.0  }
   0xa   :  { %1103 = vmatprep.mubr.msk.f32.mxu1 %vm1584_vm1, %v1583_v2  ;;  %1380 = vmatprep.subr.bf16.mxu0 %v1585_v7 }
   0xb   :  { %1173 = vmatprep.mubr.msk.f32.mxu0 %vm1584_vm1, %v1583_v2 }
   0xe   :  { %v1706_v0 = vld [vmem:[%s2232_s29] sm:$0xff] }
   0xf   :  { %v1711_v1 = vld [vmem:[%s2233_s0] sm:$0xff]  ;;  %v159_v4 = vld [vmem:[%s2234_s5 + $0x8] sm:$0xff]  ;;  %1102 = vmatpush3.msra.mxu1 %v1706_v0  ;;  %v160_v9 = vld [vmem:[%s2234_s5 + $0x10] sm:$0xff] }
  0x10   :  { %v158_v3 = vld [vmem:[%s2234_s5] sm:$0xff]  ;;  %v143_v8 = vld [vmem:[%s2235_s2 + $0x8] sm:$0xff]  ;;  %v161_v10 = vld [vmem:[%s2234_s5 + $0x18] sm:$0xff]  ;;  %1104 = vmatmul.mubr.msk.f32.vlgmr.msra.gmra.mrb[0].mxu1 %vm68_vm0, %v1711_v1  ;;  %1356 = vmatprep.subr.bf16.mxu1 %v1585_v7 }
  0x11   :  { %v142_v5 = vld [vmem:[%s2235_s2] sm:$0xff]  ;;  %v1357_v6 = vpack.c.bf16 %v159_v4, %v158_v3  ;;  %v144_v12 = vld [vmem:[%s2235_s2 + $0x10] sm:$0xff]  ;;  %v145_v13 = vld [vmem:[%s2235_s2 + $0x18] sm:$0xff]  ;;  %v1360_v14 = vpack.c.bf16 %v161_v10, %v160_v9  ;;  %1138 = vmatprep.mubr.msk.f32.mxu1 %vm1584_vm1, %v1583_v2 }
  0x12   :  { %v1381_v11 = vpack.c.bf16 %v143_v8, %v142_v5  ;;  %v1384_v15 = vpack.c.bf16 %v145_v13, %v144_v12  ;;  %v162_v16 = vld [vmem:[%s2234_s5 + $0x20] sm:$0xff]  ;;  %v163_v17 = vld [vmem:[%s2234_s5 + $0x28] sm:$0xff]  ;;  %v164_v22 = vld [vmem:[%s2234_s5 + $0x30] sm:$0xff] }
  0x13   :  { %1358 = vmatpush3.bf16.msra.mxu1 %v1357_v6  ;;  %v146_v18 = vld [vmem:[%s2235_s2 + $0x20] sm:$0xff]  ;;  %v147_v19 = vld [vmem:[%s2235_s2 + $0x28] sm:$0xff]  ;;  %v1363_v20 = vpack.c.bf16 %v163_v17, %v162_v16  ;;  %v165_v23 = vld [vmem:[%s2234_s5 + $0x38] sm:$0xff] }
  0x14   :  { %1382 = vmatpush3.bf16.msra.mxu0 %v1381_v11  ;;  %1359 = vmatprep.subr.bf16.mxu1 %v1585_v7  ;;  %v1387_v21 = vpack.c.bf16 %v147_v19, %v146_v18  ;;  %v148_v24 = vld [vmem:[%s2235_s2 + $0x30] sm:$0xff]  ;;  %v149_v25 = vld [vmem:[%s2235_s2 + $0x38] sm:$0xff] }
  0x15   :  { %1383 = vmatprep.subr.bf16.mxu0 %v1585_v7 }
  0x17   :  { %1361 = vmatpush3.bf16.msra.mxu1 %v1360_v14 }
  0x18   :  { %1385 = vmatpush3.bf16.msra.mxu0 %v1384_v15  ;;  %1362 = vmatprep.subr.bf16.mxu1 %v1585_v7 }
  0x19   :  { %1386 = vmatprep.subr.bf16.mxu0 %v1585_v7 }
  0x1a   :  { %29 = vsyncpa [#allocation5], 0  ;;  %v1366_v26 = vpack.c.bf16 %v165_v23, %v164_v22  ;;  %v1390_v27 = vpack.c.bf16 %v149_v25, %v148_v24  ;;  %v166_v28 = vld [vmem:[%s2234_s5 + $0x40] sm:$0xff]  ;;  %v167_v29 = vld [vmem:[%s2234_s5 + $0x48] sm:$0xff]  ;;  %s2236_s1 = sld [smem:[#allocation12_spill]]  ;;  %s2237_s6 = sld [smem:[#allocation13_spill]] }
  0x1b   :  { %1364 = vmatpush3.bf16.msra.mxu1 %v1363_v20  ;;  %v150_v30 = vld [vmem:[%s2235_s2 + $0x40] sm:$0xff]  ;;  %v151_v31 = vld [vmem:[%s2235_s2 + $0x48] sm:$0xff]  ;;  %v1369_v32 = vpack.c.bf16 %v167_v29, %v166_v28  ;;  %v168_v34 = vld [vmem:[%s2234_s5 + $0x50] sm:$0xff]  ;;  %s2238_s30 = sld [smem:[#allocation14_spill]]  ;;  %s1586_s0 = smov [#allocation2]  }
  0x1c   :  { %1388 = vmatpush3.bf16.msra.mxu0 %v1387_v21  ;;  %1365 = vmatprep.subr.bf16.mxu1 %v1585_v7  ;;  %v1393_v33 = vpack.c.bf16 %v151_v31, %v150_v30  ;;  %v169_v35 = vld [vmem:[%s2234_s5 + $0x58] sm:$0xff]  ;;  %v152_v36 = vld [vmem:[%s2235_s2 + $0x50] sm:$0xff]  ;;  %v170_v40 = vld [vmem:[%s2234_s5 + $0x60] sm:$0xff]  ;;  %s1587_s23 = smov [#allocation4]  }
  0x1d   :  { %1389 = vmatprep.subr.bf16.mxu0 %v1585_v7  ;;  %v153_v37 = vld [vmem:[%s2235_s2 + $0x58] sm:$0xff]  ;;  %v1372_v38 = vpack.c.bf16 %v169_v35, %v168_v34  ;;  %v171_v41 = vld [vmem:[%s2234_s5 + $0x68] sm:$0xff]  ;;  %v154_v42 = vld [vmem:[%s2235_s2 + $0x60] sm:$0xff] }
  0x1e   :  { %v1396_v39 = vpack.c.bf16 %v153_v37, %v152_v36  ;;  %v155_v43 = vld [vmem:[%s2235_s2 + $0x68] sm:$0xff]  ;;  %v1375_v44 = vpack.c.bf16 %v171_v41, %v170_v40  ;;  %v172_v46 = vld [vmem:[%s2234_s5 + $0x70] sm:$0xff]  ;;  %v173_v47 = vld [vmem:[%s2234_s5 + $0x78] sm:$0xff] }
  0x1f   :  { %1367 = vmatpush3.bf16.msra.mxu1 %v1366_v26  ;;  %v1399_v45 = vpack.c.bf16 %v155_v43, %v154_v42  ;;  %v156_v48 = vld [vmem:[%s2235_s2 + $0x70] sm:$0xff]  ;;  %v157_v49 = vld [vmem:[%s2235_s2 + $0x78] sm:$0xff]  ;;  %v1378_v50 = vpack.c.bf16 %v173_v47, %v172_v46  ;;  %v446_v56 = vld [vmem:[%s2208_s8] sm:$0xff] }
  0x20   :  { %1391 = vmatpush3.bf16.msra.mxu0 %v1390_v27  ;;  %1368 = vmatprep.subr.bf16.mxu1 %v1585_v7  ;;  %v1402_v51 = vpack.c.bf16 %v157_v49, %v156_v48  ;;  %v447_v57 = vld [vmem:[%s2208_s8 + $0x8] sm:$0xff]  ;;  %v448_v59 = vld [vmem:[%s2208_s8 + $0x10] sm:$0xff]  ;;  %v449_v60 = vld [vmem:[%s2208_s8 + $0x18] sm:$0xff] }
  0x21   :  { %1392 = vmatprep.subr.bf16.mxu0 %v1585_v7  ;;  %v1405_v58 = vpack.c.bf16 %v447_v57, %v446_v56  ;;  %v1408_v61 = vpack.c.bf16 %v449_v60, %v448_v59  ;;  %v450_v62 = vld [vmem:[%s2208_s8 + $0x20] sm:$0xff]  ;;  %v451_v63 = vld [vmem:[%s2208_s8 + $0x28] sm:$0xff]  ;;  %v452_v3 = vld [vmem:[%s2208_s8 + $0x30] sm:$0xff] }
  0x22   :  { %v453_v4 = vld [vmem:[%s2208_s8 + $0x38] sm:$0xff]  ;;  %v454_v6 = vld [vmem:[%s2208_s8 + $0x40] sm:$0xff]  ;;  %v455_v8 = vld [vmem:[%s2208_s8 + $0x48] sm:$0xff] }
  0x23   :  { %1370 = vmatpush3.bf16.msra.mxu1 %v1369_v32  ;;  %v1414_v5 = vpack.c.bf16 %v453_v4, %v452_v3  ;;  %v1417_v9 = vpack.c.bf16 %v455_v8, %v454_v6  ;;  %v456_v10 = vld [vmem:[%s2208_s8 + $0x50] sm:$0xff]  ;;  %v457_v11 = vld [vmem:[%s2208_s8 + $0x58] sm:$0xff]  ;;  %v458_v13 = vld [vmem:[%s2208_s8 + $0x60] sm:$0xff] }
  0x24   :  { %1394 = vmatpush3.bf16.msra.mxu0 %v1393_v33  ;;  %1371 = vmatprep.subr.bf16.mxu1 %v1585_v7  ;;  %v1420_v12 = vpack.c.bf16 %v457_v11, %v456_v10  ;;  %v459_v14 = vld [vmem:[%s2208_s8 + $0x68] sm:$0xff]  ;;  %v460_v16 = vld [vmem:[%s2208_s8 + $0x70] sm:$0xff]  ;;  %v461_v17 = vld [vmem:[%s2208_s8 + $0x78] sm:$0xff] }
  0x25   :  { %1395 = vmatprep.subr.bf16.mxu0 %v1585_v7  ;;  %v1423_v15 = vpack.c.bf16 %v459_v14, %v458_v13  ;;  %v1426_v18 = vpack.c.bf16 %v461_v17, %v460_v16  ;;  %v969_v20 = vld [vmem:[%s2236_s1] ss:$0 sm:$0xff]  ;;  %v627_v46 = vld [vmem:[%s2211_s11 + $0x8] sm:$0xff]  ;;  %v432_v57 = vld [vmem:[%s2207_s7 + $0x10] sm:$0xff]  ;;  %s946_s1 = sshll.u32 %s1587_s23, 4  ;;  %s947_s1 = int_to_ptr.vmem [resolvable:$true] %s946_s1 }
  0x26   :  { %v970_v43 = vld [vmem:[%s2237_s6] ss:$0 sm:$0xff]  ;;  %v631_v60 = vld [vmem:[%s2211_s11 + $0x28] sm:$0xff]  ;;  %v633_v3 = vld [vmem:[%s2211_s11 + $0x38] sm:$0xff] }
  0x27   :  { %1373 = vmatpush3.bf16.msra.mxu1 %v1372_v38  ;;  %v971_v47 = vld [vmem:[%s2238_s30] ss:$0 sm:$0xff]  ;;  %v436_v6 = vld [vmem:[%s2207_s7 + $0x30] sm:$0xff]  ;;  %v437_v8 = vld [vmem:[%s2207_s7 + $0x38] sm:$0xff] }
  0x28   :  { %1397 = vmatpush3.bf16.msra.mxu0 %v1396_v39  ;;  %1374 = vmatprep.subr.bf16.mxu1 %v1585_v7  ;;  %v630_v59 = vld [vmem:[%s2211_s11 + $0x20] sm:$0xff]  ;;  %v635_v10 = vld [vmem:[%s2211_s11 + $0x48] sm:$0xff]  ;;  %v1438_v11 = vpack.c.bf16 %v437_v8, %v436_v6  ;;  %v637_v16 = vld [vmem:[%s2211_s11 + $0x58] sm:$0xff] }
  0x29   :  { %1398 = vmatprep.subr.bf16.mxu0 %v1585_v7  ;;  %v438_v13 = vld [vmem:[%s2207_s7 + $0x40] sm:$0xff]  ;;  %v439_v14 = vld [vmem:[%s2207_s7 + $0x48] sm:$0xff] }
  0x2a   :  { %v1441_v17 = vpack.c.bf16 %v439_v14, %v438_v13  ;;  %v802_v6 = vld [vmem:[%s2214_s14 + $0x20] sm:$0xff]  ;;  %v803_v8 = vld [vmem:[%s2214_s14 + $0x28] sm:$0xff] }
  0x2b   :  { %1376 = vmatpush3.bf16.msra.mxu1 %v1375_v44  ;;  %v806_v13 = vld [vmem:[%s2214_s14 + $0x40] sm:$0xff]  ;;  %v807_v14 = vld [vmem:[%s2214_s14 + $0x48] sm:$0xff] }
  0x2c   :  { %1400 = vmatpush3.bf16.msra.mxu0 %v1399_v45  ;;  %1377 = vmatprep.subr.bf16.mxu1 %v1585_v7  ;;  %v626_v45 = vld [vmem:[%s2211_s11] sm:$0xff] }
  0x2d   :  { %1401 = vmatprep.subr.bf16.mxu0 %v1585_v7  ;;  %v1453_v49 = vpack.c.bf16 %v627_v46, %v626_v45  ;;  %v615_v45 = vld [vmem:[%s2210_s10 + $0x28] sm:$0xff] }
  0x2f   :  { %1379 = vmatpush3.bf16.msra.mxu1 %v1378_v50  ;;  %v430_v50 = vld [vmem:[%s2207_s7] sm:$0xff] }
  0x30   :  { %1403 = vmatpush3.bf16.msra.mxu0 %v1402_v51  ;;  %1176 = vmatprep.subr.mxu1 %v1583_v2  ;;  %v431_v51 = vld [vmem:[%s2207_s7 + $0x8] sm:$0xff] }
  0x31   :  { %1404 = vmatprep.subr.bf16.mxu0 %v1585_v7 }
  0x32   :  { %1139 = vmatmul.mubr.f32.vlgmr.msra.gmra.mrb[2].mxu1 %v1706_v0  ;;  %v1411_v0 = vpack.c.bf16 %v451_v63, %v450_v62  ;;  %v434_v62 = vld [vmem:[%s2207_s7 + $0x20] sm:$0xff]  ;;  %v435_v63 = vld [vmem:[%s2207_s7 + $0x28] sm:$0xff] }
  0x33   :  { %1178 = vmatprep.mubr.msk.f32.mxu1 %vm1584_vm1, %v1583_v2  ;;  %v1435_v4 = vpack.c.bf16 %v435_v63, %v434_v62  ;;  %v798_v62 = vld [vmem:[%s2214_s14] sm:$0xff]  ;;  %v799_v63 = vld [vmem:[%s2214_s14 + $0x8] sm:$0xff] }
  0xe3   :  { %v138_v52 = vpop.f32.mrb[0].mxu1 }
  0xe4   :  { %v1105_v53 = vpop.f32.mrb[1].mxu1  ;;  %1174 = vmatmul.mubr.f32.vlgmr.msra.gmra.mrb[0].mxu0 %v138_v52 }
  0xe5   :  { %1213 = vmatprep.mubr.msk.f32.mxu0 %vm1584_vm1, %v1583_v2  ;;  %1406 = vmatpush3.bf16.msra.mxu0 %v1405_v58  ;;  %v628_v53 = vld [vmem:[%s2211_s11 + $0x10] sm:$0xff]  ;;  %v433_v58 = vld [vmem:[%s2207_s7 + $0x18] sm:$0xff] }
  0xe6   :  { %1407 = vmatprep.subr.bf16.mxu0 %v1585_v7 }
  0xe9   :  { %1409 = vmatpush3.bf16.msra.mxu0 %v1408_v61  ;;  %v1459_v61 = vpack.c.bf16 %v631_v60, %v630_v59  ;;  %v625_v59 = vld [vmem:[%s2210_s10 + $0x78] sm:$0xff] }
  0xea   :  { %1410 = vmatprep.subr.bf16.mxu0 %v1585_v7 }
  0xed   :  { %1412 = vmatpush3.bf16.msra.mxu0 %v1411_v0  ;;  %v632_v0 = vld [vmem:[%s2211_s11 + $0x30] sm:$0xff] }
  0xee   :  { %1413 = vmatprep.subr.bf16.mxu0 %v1585_v7 }
  0xf1   :  { %1415 = vmatpush3.bf16.msra.mxu0 %v1414_v5  ;;  %v1462_v5 = vpack.c.bf16 %v633_v3, %v632_v0  ;;  %v800_v0 = vld [vmem:[%s2214_s14 + $0x10] sm:$0xff]  ;;  %v1501_v3 = vpack.c.bf16 %v799_v63, %v798_v62 }
  0xf2   :  { %1416 = vmatprep.subr.bf16.mxu0 %v1585_v7 }
  0xf5   :  { %1418 = vmatpush3.bf16.msra.mxu0 %v1417_v9  ;;  %v634_v9 = vld [vmem:[%s2211_s11 + $0x40] sm:$0xff] }
  0xf6   :  { %1419 = vmatprep.subr.bf16.mxu0 %v1585_v7 }
  0xf9   :  { %1421 = vmatpush3.bf16.msra.mxu0 %v1420_v12  ;;  %v1465_v12 = vpack.c.bf16 %v635_v10, %v634_v9  ;;  %v1507_v9 = vpack.c.bf16 %v803_v8, %v802_v6  ;;  %v804_v10 = vld [vmem:[%s2214_s14 + $0x30] sm:$0xff] }
  0xfa   :  { %1422 = vmatprep.subr.bf16.mxu0 %v1585_v7 }
  0xfd   :  { %1424 = vmatpush3.bf16.msra.mxu0 %v1423_v15  ;;  %v636_v15 = vld [vmem:[%s2211_s11 + $0x50] sm:$0xff] }
  0xfe   :  { %1425 = vmatprep.subr.bf16.mxu0 %v1585_v7 }
 0x101   :  { %1427 = vmatpush3.bf16.msra.mxu0 %v1426_v18  ;;  %v1468_v18 = vpack.c.bf16 %v637_v16, %v636_v15  ;;  %v1513_v15 = vpack.c.bf16 %v807_v14, %v806_v13  ;;  %v808_v16 = vld [vmem:[%s2214_s14 + $0x50] sm:$0xff] }
 0x102   :  { %1452 = vmatprep.subr.bf16.mxu0 %v1585_v7 }
 0x105   :  { %v240_v54 = vpop.f32.mrb[2].mxu1 }
 0x106   :  { %v1140_v55 = vpop.f32.mrb[3].mxu1 }
 0x107   :  { %v1429_v55 = vpack.c.bf16 %v431_v51, %v430_v50  ;;  %v619_v50 = vld [vmem:[%s2210_s10 + $0x48] sm:$0xff] }
 0x1b7   :  { %v310_v19 = vpop.f32.mrb[0].mxu0 }
 0x1b8   :  { %v311_v21 = vadd.f32 %v310_v19, %v240_v54  ;;  %v1175_v22 = vpop.f32.mrb[1].mxu0  ;;  %v629_v54 = vld [vmem:[%s2211_s11 + $0x18] sm:$0xff]  ;;  %v440_v19 = vld [vmem:[%s2207_s7 + $0x50] sm:$0xff] }
 0x1b9   :  { %v1456_v56 = vpack.c.bf16 %v629_v54, %v628_v53  ;;  %v639_v22 = vld [vmem:[%s2211_s11 + $0x68] sm:$0xff]  ;;  %v621_v53 = vld [vmem:[%s2210_s10 + $0x58] sm:$0xff] }
 0x1ba   :  { %v321_v23 = vadd.f32 %v969_v20, %v311_v21  ;;  %v441_v20 = vld [vmem:[%s2207_s7 + $0x58] sm:$0xff]  ;;  %v638_v21 = vld [vmem:[%s2211_s11 + $0x60] sm:$0xff] }
 0x1bc   :  { %v322_v24 = vmax.f32 %v321_v23, 0.0  ;;  %v1444_v23 = vpack.c.bf16 %v441_v20, %v440_v19  ;;  %v810_v19 = vld [vmem:[%s2214_s14 + $0x60] sm:$0xff]  ;;  %v811_v20 = vld [vmem:[%s2214_s14 + $0x68] sm:$0xff] }
 0x1be   :  { %v325_v25 = vrot.slane %v322_v24, 4 }
 0x1c0   :  { %v326_v26 = vadd.f32 %v325_v25, %v322_v24  ;;  %v442_v25 = vld [vmem:[%s2207_s7 + $0x60] sm:$0xff] }
 0x1c2   :  { %v327_v27 = vrot.slane %v326_v26, 2 }
 0x1c4   :  { %v328_v28 = vadd.f32 %v327_v27, %v326_v26  ;;  %v443_v26 = vld [vmem:[%s2207_s7 + $0x68] sm:$0xff]  ;;  %v640_v27 = vld [vmem:[%s2211_s11 + $0x70] sm:$0xff] }
 0x1c6   :  { %v329_v29 = vrot.slane %v328_v28, 1 }
 0x1c8   :  { %v330_v30 = vadd.f32 %v329_v29, %v328_v28  ;;  %v641_v28 = vld [vmem:[%s2211_s11 + $0x78] sm:$0xff]  ;;  %v1447_v29 = vpack.c.bf16 %v443_v26, %v442_v25  ;;  %v973_v26 = vld [vmem:[%s2209_s9] ss:$0 sm:$0xff] }
 0x1ca   :  { %v332_v31 = vmul.f32 0.125, %v330_v30  ;;  %v1474_v30 = vpack.c.bf16 %v641_v28, %v640_v27 }
 0x1cc   :  { %v333_v32 = vsub.f32 %v322_v24, %v332_v31  ;;  %v1471_v24 = vpack.c.bf16 %v639_v22, %v638_v21  ;;  %v444_v31 = vld [vmem:[%s2207_s7 + $0x70] sm:$0xff]  ;;  %v1519_v21 = vpack.c.bf16 %v811_v20, %v810_v19 }
 0x1cd   :  { %v812_v22 = vld [vmem:[%s2214_s14 + $0x70] sm:$0xff] }
 0x1ce   :  { %v334_v33 = vmul.f32 %v333_v32, %v333_v32 }
 0x1d0   :  { %v335_v34 = vrot.slane %v334_v33, 4 }
 0x1d2   :  { %v336_v35 = vadd.f32 %v335_v34, %v334_v33  ;;  %v610_v34 = vld [vmem:[%s2210_s10] sm:$0xff] }
 0x1d4   :  { %v337_v36 = vrot.slane %v336_v35, 2 }
 0x1d6   :  { %v338_v37 = vadd.f32 %v337_v36, %v336_v35  ;;  %v611_v35 = vld [vmem:[%s2210_s10 + $0x8] sm:$0xff] }
 0x1d7   :  { %v1477_v36 = vpack.c.bf16 %v611_v35, %v610_v34  ;;  %v794_v35 = vld [vmem:[%s2213_s13] sm:$0xff] }
 0x1d8   :  { %v339_v38 = vrot.slane %v338_v37, 1 }
 0x1da   :  { %v340_v39 = vadd.f32 %v339_v38, %v338_v37  ;;  %v612_v38 = vld [vmem:[%s2210_s10 + $0x10] sm:$0xff] }
 0x1dc   :  { %v341_v40 = vmul.f32 0.125, %v340_v39  ;;  %v613_v39 = vld [vmem:[%s2210_s10 + $0x18] sm:$0xff] }
 0x1de   :  { %v342_v41 = vadd.f32 1e-05, %v341_v40 }
 0x1e0   :  { %1529 = vrsqrt.f32 %v342_v41 }
 0x1ea   :  { %v1530_v42 = vpop.eup %1529 }
 0x1eb   :  { %v344_v44 = vmul.f32 %v1530_v42, %v333_v32  ;;  %v445_v32 = vld [vmem:[%s2207_s7 + $0x78] sm:$0xff] }
 0x1ec   :  { %v1450_v33 = vpack.c.bf16 %v445_v32, %v444_v31  ;;  %v974_v31 = vld [vmem:[%s2212_s12] ss:$0 sm:$0xff]  ;;  %s936_s12 = sshll.u32 %s1586_s0, 4  ;;  %s937_s12 = int_to_ptr.vmem [resolvable:$true] %s936_s12 }
 0x1ed   :  { %v351_v48 = vmul.f32 %v970_v43, %v344_v44  ;;  %v1480_v43 = vpack.c.bf16 %v613_v39, %v612_v38  ;;  %v614_v44 = vld [vmem:[%s2210_s10 + $0x20] sm:$0xff]  ;;  %s1535_s8 = scalar_lea.vmem %s937_s12, 128  ;;  %p1540_p1 = scmp.lt.s32.totalorder %s937_s12, %s937_s12 }
 0x1ee   :  { %v1483_v46 = vpack.c.bf16 %v615_v45, %v614_v44  ;;  %p1536_p0 = scmp.ne.s32.totalorder %s937_s12, %s1535_s8  ;;  %p1541_p2 = scmp.lt.s32.totalorder %s1535_s8, %s1535_s8 }
 0x1ef   :  { %v1919_v52 = vadd.f32 %v971_v47, %v351_v48  ;;  %v616_v47 = vld [vmem:[%s2210_s10 + $0x30] sm:$0xff] }
 0x1f0   :  { %p1542_p3 = por %p1541_p2, %p1540_p1 }
 0x1f1   :  { %359 = vst [vmem:[%s2218_s18] sm:$0xff] %v1919_v52  ;;  %1177 = vmatpush3.msra.mxu1 %v1919_v52  ;;  %1214 = vmatmul.mubr.f32.vlgmr.msra.gmra.mrb[2].mxu0 %v1919_v52 }
 0x1f2   :  { %1454 = vmatpush3.bf16.msra.mxu0 %v1453_v49  ;;  %1179 = vmatmul.mubr.msk.f32.vlgmr.msra.gmra.mrb[4].mxu1 %vm68_vm0, %v1711_v1  ;;  %v1432_v1 = vpack.c.bf16 %v433_v58, %v432_v57  ;;  %v618_v49 = vld [vmem:[%s2210_s10 + $0x40] sm:$0xff]  ;;  %v624_v58 = vld [vmem:[%s2210_s10 + $0x70] sm:$0xff]  ;;  %p1543_p4 = pnand %p1542_p3, %p1536_p0 }
 0x1f3   :  { %1455 = vmatprep.subr.bf16.mxu0 %v1585_v7  ;;  %1283 = vmatprep.mubr.msk.f32.mxu0 %vm1584_vm1, %v1583_v2  ;;  %v1489_v51 = vpack.c.bf16 %v619_v50, %v618_v49  ;;  %v1498_v60 = vpack.c.bf16 %v625_v59, %v624_v58 }
 0x1f4   :  { %1428 = vmatprep.subr.bf16.mxu1 %v1585_v7  ;;  %1248 = vmatprep.mubr.msk.f32.mxu1 %vm1584_vm1, %v1583_v2 }
 0x1f5   :  { %1430 = vmatpush3.bf16.msra.mxu1 %v1429_v55  ;;  %v622_v55 = vld [vmem:[%s2210_s10 + $0x60] sm:$0xff] }
 0x1f6   :  { %1457 = vmatpush3.bf16.msra.mxu0 %v1456_v56  ;;  %1431 = vmatprep.subr.bf16.mxu1 %v1585_v7  ;;  %v623_v56 = vld [vmem:[%s2210_s10 + $0x68] sm:$0xff] }
 0x1f7   :  { %1458 = vmatprep.subr.bf16.mxu0 %v1585_v7  ;;  %v1495_v57 = vpack.c.bf16 %v623_v56, %v622_v55 }
 0x1f9   :  { %1433 = vmatpush3.bf16.msra.mxu1 %v1432_v1 }
 0x1fa   :  { %1460 = vmatpush3.bf16.msra.mxu0 %v1459_v61  ;;  %1434 = vmatprep.subr.bf16.mxu1 %v1585_v7 }
 0x1fb   :  { %1461 = vmatprep.subr.bf16.mxu0 %v1585_v7 }
 0x1fd   :  { %1436 = vmatpush3.bf16.msra.mxu1 %v1435_v4  ;;  %v801_v4 = vld [vmem:[%s2214_s14 + $0x18] sm:$0xff] }
 0x1fe   :  { %1463 = vmatpush3.bf16.msra.mxu0 %v1462_v5  ;;  %1437 = vmatprep.subr.bf16.mxu1 %v1585_v7  ;;  %v1504_v5 = vpack.c.bf16 %v801_v4, %v800_v0 }
 0x1ff   :  { %1464 = vmatprep.subr.bf16.mxu0 %v1585_v7 }
 0x201   :  { %1439 = vmatpush3.bf16.msra.mxu1 %v1438_v11  ;;  %v805_v11 = vld [vmem:[%s2214_s14 + $0x38] sm:$0xff] }
 0x202   :  { %1466 = vmatpush3.bf16.msra.mxu0 %v1465_v12  ;;  %1440 = vmatprep.subr.bf16.mxu1 %v1585_v7  ;;  %v1510_v12 = vpack.c.bf16 %v805_v11, %v804_v10 }
 0x203   :  { %1467 = vmatprep.subr.bf16.mxu0 %v1585_v7 }
 0x205   :  { %1442 = vmatpush3.bf16.msra.mxu1 %v1441_v17  ;;  %v809_v17 = vld [vmem:[%s2214_s14 + $0x58] sm:$0xff] }
 0x206   :  { %1469 = vmatpush3.bf16.msra.mxu0 %v1468_v18  ;;  %1443 = vmatprep.subr.bf16.mxu1 %v1585_v7  ;;  %v1516_v18 = vpack.c.bf16 %v809_v17, %v808_v16 }
 0x207   :  { %1470 = vmatprep.subr.bf16.mxu0 %v1585_v7 }
 0x209   :  { %1445 = vmatpush3.bf16.msra.mxu1 %v1444_v23  ;;  %v813_v23 = vld [vmem:[%s2214_s14 + $0x78] sm:$0xff] }
 0x20a   :  { %1472 = vmatpush3.bf16.msra.mxu0 %v1471_v24  ;;  %1446 = vmatprep.subr.bf16.mxu1 %v1585_v7  ;;  %v1522_v24 = vpack.c.bf16 %v813_v23, %v812_v22 }
 0x20b   :  { %1473 = vmatprep.subr.bf16.mxu0 %v1585_v7 }
 0x20d   :  { %1448 = vmatpush3.bf16.msra.mxu1 %v1447_v29 }
 0x20e   :  { %1475 = vmatpush3.bf16.msra.mxu0 %v1474_v30  ;;  %1449 = vmatprep.subr.bf16.mxu1 %v1585_v7 }
 0x20f   :  { %1500 = vmatprep.subr.bf16.mxu0 %v1585_v7 }
 0x211   :  { %1284 = vmatmul.mubr.f32.vlgmr.msra.gmra.mrb[4].mxu0 %v1919_v52  ;;  %1451 = vmatpush3.bf16.msra.mxu1 %v1450_v33  ;;  %v620_v52 = vld [vmem:[%s2210_s10 + $0x50] sm:$0xff] }
 0x212   :  { %1476 = vmatprep.subr.bf16.mxu1 %v1585_v7  ;;  %1353 = vmatprep.mubr.msk.f32.mxu0 %vm1584_vm1, %v1583_v2  ;;  %v1492_v54 = vpack.c.bf16 %v621_v53, %v620_v52 }
 0x213   :  { %1502 = vmatpush3.bf16.msra.mxu0 %v1501_v3 }
 0x214   :  { %1503 = vmatprep.subr.bf16.mxu0 %v1585_v7 }
 0x217   :  { %1505 = vmatpush3.bf16.msra.mxu0 %v1504_v5 }
 0x218   :  { %1506 = vmatprep.subr.bf16.mxu0 %v1585_v7 }
 0x21b   :  { %1508 = vmatpush3.bf16.msra.mxu0 %v1507_v9 }
 0x21c   :  { %1509 = vmatprep.subr.bf16.mxu0 %v1585_v7 }
 0x21f   :  { %1511 = vmatpush3.bf16.msra.mxu0 %v1510_v12 }
 0x220   :  { %1512 = vmatprep.subr.bf16.mxu0 %v1585_v7 }
 0x223   :  { %1514 = vmatpush3.bf16.msra.mxu0 %v1513_v15 }
 0x224   :  { %1515 = vmatprep.subr.bf16.mxu0 %v1585_v7 }
 0x227   :  { %1517 = vmatpush3.bf16.msra.mxu0 %v1516_v18 }
 0x228   :  { %1518 = vmatprep.subr.bf16.mxu0 %v1585_v7 }
 0x22b   :  { %1520 = vmatpush3.bf16.msra.mxu0 %v1519_v21 }
 0x22c   :  { %1521 = vmatprep.subr.bf16.mxu0 %v1585_v7 }
 0x22f   :  { %1523 = vmatpush3.bf16.msra.mxu0 %v1522_v24 }
 0x2c4   :  { %v2043_v37 = vpop.f32.mrb[2].mxu0 }
 0x2c5   :  { %v426_v40 = vpop.f32.mrb[4].mxu1  ;;  %v1215_v41 = vpop.f32.mrb[3].mxu0 }
 0x2c6   :  { %1249 = vmatmul.mubr.f32.vlgmr.msra.gmra.mrb[6].mxu1 %v426_v40  ;;  %v1180_v42 = vpop.f32.mrb[5].mxu1 }
 0x2c7   :  { %1478 = vmatpush3.bf16.msra.mxu1 %v1477_v36  ;;  %1318 = vmatprep.mubr.msk.f32.mxu1 %vm1584_vm1, %v1583_v2  ;;  %v617_v2 = vld [vmem:[%s2210_s10 + $0x38] sm:$0xff] }
 0x2c8   :  { %1479 = vmatprep.subr.bf16.mxu1 %v1585_v7  ;;  %v1486_v48 = vpack.c.bf16 %v617_v2, %v616_v47 }
 0x2cb   :  { %1481 = vmatpush3.bf16.msra.mxu1 %v1480_v43 }
 0x2cc   :  { %1482 = vmatprep.subr.bf16.mxu1 %v1585_v7 }
 0x2cf   :  { %1484 = vmatpush3.bf16.msra.mxu1 %v1483_v46 }
 0x2d0   :  { %1485 = vmatprep.subr.bf16.mxu1 %v1585_v7 }
 0x2d3   :  { %1487 = vmatpush3.bf16.msra.mxu1 %v1486_v48 }
 0x2d4   :  { %1488 = vmatprep.subr.bf16.mxu1 %v1585_v7 }
 0x2d7   :  { %1490 = vmatpush3.bf16.msra.mxu1 %v1489_v51 }
 0x2d8   :  { %1491 = vmatprep.subr.bf16.mxu1 %v1585_v7 }
 0x2db   :  { %1493 = vmatpush3.bf16.msra.mxu1 %v1492_v54 }
 0x2dc   :  { %1494 = vmatprep.subr.bf16.mxu1 %v1585_v7 }
 0x2df   :  { %1496 = vmatpush3.bf16.msra.mxu1 %v1495_v57 }
 0x2e0   :  { %1497 = vmatprep.subr.bf16.mxu1 %v1585_v7 }
 0x2e3   :  { %1499 = vmatpush3.bf16.msra.mxu1 %v1498_v60 }
 0x2e4   :  { %v708_v1 = vpop.f32.mrb[4].mxu0 }
 0x2e5   :  { %v1285_v61 = vpop.f32.mrb[5].mxu0 }
 0x2e6   :  { %1319 = vmatmul.mubr.f32.vlgmr.msra.gmra.mrb[8].mxu1 %v426_v40 }
 0x399   :  { %v598_v25 = vpop.f32.mrb[6].mxu1 }
 0x39a   :  { %v599_v27 = vadd.f32 %v598_v25, %v2043_v37  ;;  %v1250_v28 = vpop.f32.mrb[7].mxu1 }
 0x39c   :  { %v609_v29 = vadd.f32 %v973_v26, %v599_v27 }
 0x39e   :  { %790 = vst [vmem:[#allocation2] sm:$0xff] %v609_v29 }
 0x3b9   :  { %v778_v30 = vpop.f32.mrb[8].mxu1 }
 0x3ba   :  { %v779_v32 = vadd.f32 %v778_v30, %v708_v1  ;;  %v1320_v33 = vpop.f32.mrb[9].mxu1 }
 0x3bc   :  { %v789_v34 = vadd.f32 %v974_v31, %v779_v32 }
 0x3be   :  { %v792_v7 = vmul.f32 1.442695, %v789_v34  ;;  %791 = vst [vmem:[#allocation4] sm:$0xff] %v789_v34 }
 0x3c0   :  { %1531 = vpow2.f32 %v792_v7 }
 0x3ca   :  { %v1532_v36 = vpop.eup %1531 }
 0x3cb   :  { %v795_v37 = vmul.f32 %v1532_v36, %v794_v35 }
 0x3cd   :  { %v796_v38 = vadd.f32 %v795_v37, %v609_v29 }
 0x3cf   :  { %797 = vst [vmem:[%s2221_s21] sm:$0xff] %v796_v38  ;;  %1354 = vmatmul.mubr.f32.vlgmr.msra.gmra.mrb[6].mxu0 %v796_v38 }
 0x3d0   :  { %1546 = shalt.err (!%p1543_p4)
}
 0x3d1   :  { %s1547_s6 = scalar_lea.hbm %s2219_s19, 128 }
 0x3d2   :  { %p1548_p5 = scmp.ne.s32.totalorder %s2219_s19, %s1547_s6  ;;  %p1551_p6 = scmp.lt.u32.totalorder %s1547_s6, %s2219_s19 }
 0x3d4   :  { %p1553_p7 = pnand %p1551_p6, %p1548_p5 }
 0x3d6   :  { %1556 = shalt.err (!%p1553_p7)
}
 0x3d7   :  { %939 = dma.vmem_to_hbm [thread:$0]  %s937_s12, 128, %s2219_s19, [#allocation3]  }
 0x3d8   :  { %s1557_s7 = scalar_lea.vmem %s947_s1, 128  ;;  %p1562_p9 = scmp.lt.s32.totalorder %s947_s1, %s947_s1 }
 0x3d9   :  { %p1558_p8 = scmp.ne.s32.totalorder %s947_s1, %s1557_s7  ;;  %p1563_p10 = scmp.lt.s32.totalorder %s1557_s7, %s1557_s7 }
 0x3db   :  { %p1564_p11 = por %p1563_p10, %p1562_p9 }
 0x3dd   :  { %p1565_p12 = pnand %p1564_p11, %p1558_p8 }
 0x3df   :  { %1568 = shalt.err (!%p1565_p12)
}
 0x3e0   :  { %s1569_s18 = scalar_lea.hbm %s2220_s20, 128 }
 0x3e1   :  { %p1570_p13 = scmp.ne.s32.totalorder %s2220_s20, %s1569_s18  ;;  %p1573_p0 = scmp.lt.u32.totalorder %s1569_s18, %s2220_s20 }
 0x3e3   :  { %p1575_p1 = pnand %p1573_p0, %p1570_p13 }
 0x3e5   :  { %1578 = shalt.err (!%p1575_p1)
}
 0x3e6   :  { %949 = dma.vmem_to_hbm [thread:$0]  %s947_s1, 128, %s2220_s20, [#allocation5]   ;;  %v975_v39 = vld [vmem:[%s2215_s15] ss:$0 sm:$0xff] }
 0x3e7   :  { %v976_v1 = vld [vmem:[%s2216_s16] ss:$0 sm:$0xff] }
 0x3e8   :  { %v977_v62 = vld [vmem:[%s2217_s17] ss:$0 sm:$0xff] }
 0x4a2   :  { %v887_v40 = vpop.f32.mrb[6].mxu0 }
 0x4a3   :  { %v888_v41 = vadd.f32 %v975_v39, %v887_v40  ;;  %v1355_v42 = vpop.f32.mrb[7].mxu0 }
 0x4a5   :  { %v891_v43 = vmax.f32 %v888_v41, 0.0 }
 0x4a7   :  { %v894_v44 = vrot.slane %v891_v43, 4 }
 0x4a9   :  { %v895_v45 = vadd.f32 %v894_v44, %v891_v43 }
 0x4ab   :  { %v896_v46 = vrot.slane %v895_v45, 2 }
 0x4ad   :  { %v897_v47 = vadd.f32 %v896_v46, %v895_v45 }
 0x4af   :  { %v898_v2 = vrot.slane %v897_v47, 1 }
 0x4b1   :  { %v899_v48 = vadd.f32 %v898_v2, %v897_v47 }
 0x4b3   :  { %v900_v49 = vmul.f32 0.125, %v899_v48 }
 0x4b5   :  { %v901_v50 = vsub.f32 %v891_v43, %v900_v49 }
 0x4b7   :  { %v902_v51 = vmul.f32 %v901_v50, %v901_v50 }
 0x4b9   :  { %v903_v52 = vrot.slane %v902_v51, 4 }
 0x4bb   :  { %v904_v53 = vadd.f32 %v903_v52, %v902_v51 }
 0x4bd   :  { %v905_v54 = vrot.slane %v904_v53, 2 }
 0x4bf   :  { %v906_v55 = vadd.f32 %v905_v54, %v904_v53 }
 0x4c1   :  { %v907_v56 = vrot.slane %v906_v55, 1 }
 0x4c3   :  { %v908_v57 = vadd.f32 %v907_v56, %v906_v55 }
 0x4c5   :  { %v909_v58 = vmul.f32 0.125, %v908_v57 }
 0x4c7   :  { %v910_v59 = vadd.f32 1e-05, %v909_v58 }
 0x4c9   :  { %1533 = vrsqrt.f32 %v910_v59 }
 0x4d3   :  { %v1534_v60 = vpop.eup %1533 }
 0x4d4   :  { %v912_v61 = vmul.f32 %v1534_v60, %v901_v50 }
 0x4d6   :  { %v919_v63 = vmul.f32 %v976_v1, %v912_v61 }
 0x4d8   :  { %v926_v0 = vadd.f32 %v977_v62, %v919_v63 }
 0x4da   :  { %927 = vst [vmem:[%s2222_s22] sm:$0xff] %v926_v0 }
 0x4db   :  { %1579 = dma.done.wait [#allocation3], 128  }
 0x4dc   :  { %1580 = vsyncadd [#allocation3], 4294967168 }
 0x4dd   :  { %1581 = dma.done.wait [#allocation5], 128  }
 0x4de   :  { %1582 = vsyncadd [#allocation5], 4294967168 }
 0x4df   :  { %966 = vsyncpa [#allocation3], 1 }
 0x4e0   :  { %967 = vsyncpa [#allocation5], 1 }

// kernel: vae_forward.5
= control target key start
LH: loop header
LB: loop body
LE: loop exit
PB: predicated region body
PF: predicated region fallthrough
CT: control target
= control target key end

     0   :  { %s289_s1 = inlined_call_operand.vmem [shape: f32[128,128], index: 1, kind: input, shape index: {}]   ;;  %s290_s0 = inlined_call_operand.vmem [shape: f32[16,128], index: 0, kind: input, shape index: {}]   ;;  %s291_s2 = inlined_call_operand.vmem [shape: f32[1,128], index: 2, kind: input, shape index: {}]   ;;  %s292_s3 = inlined_call_operand.vmem [shape: f32[16,128], index: 3, kind: output, shape index: {}]  }
   0x1   :  { %v16_v0 = vld [vmem:[%s289_s1] sm:$0xff]  ;;  %v17_v1 = vld [vmem:[%s289_s1 + $0x8] sm:$0xff]  ;;  %v18_v2 = vld [vmem:[%s289_s1 + $0x10] sm:$0xff] }
   0x2   :  { %v174_v3 = vpack.c.bf16 %v17_v1, %v16_v0  ;;  %v19_v4 = vld [vmem:[%s289_s1 + $0x18] sm:$0xff]  ;;  %v20_v6 = vld [vmem:[%s289_s1 + $0x20] sm:$0xff]  ;;  %v21_v7 = vld [vmem:[%s289_s1 + $0x28] sm:$0xff] }
   0x3   :  { %v178_v5 = vpack.c.bf16 %v19_v4, %v18_v2  ;;  %v182_v8 = vpack.c.bf16 %v21_v7, %v20_v6  ;;  %v14_v9 = vld [vmem:[%s290_s0] sm:$0xff]  ;;  %v22_v10 = vld [vmem:[%s289_s1 + $0x30] sm:$0xff]  ;;  %v23_v11 = vld [vmem:[%s289_s1 + $0x38] sm:$0xff] }
   0x4   :  { %175 = vmatprep.subr.bf16.mxu0 %v174_v3  ;;  %171 = vmatprep.mubr.f32.mxu0 %v14_v9  ;;  %v186_v12 = vpack.c.bf16 %v23_v11, %v22_v10  ;;  %v24_v13 = vld [vmem:[%s289_s1 + $0x40] sm:$0xff]  ;;  %v25_v14 = vld [vmem:[%s289_s1 + $0x48] sm:$0xff]  ;;  %v26_v16 = vld [vmem:[%s289_s1 + $0x50] sm:$0xff] }
   0x5   :  { %177 = vmatpush3.bf16.msra.mxu0 %v174_v3  ;;  %v190_v15 = vpack.c.bf16 %v25_v14, %v24_v13  ;;  %v27_v17 = vld [vmem:[%s289_s1 + $0x58] sm:$0xff]  ;;  %v28_v19 = vld [vmem:[%s289_s1 + $0x60] sm:$0xff]  ;;  %v29_v20 = vld [vmem:[%s289_s1 + $0x68] sm:$0xff] }
   0x6   :  { %179 = vmatprep.subr.bf16.mxu0 %v178_v5  ;;  %v194_v18 = vpack.c.bf16 %v27_v17, %v26_v16  ;;  %v198_v21 = vpack.c.bf16 %v29_v20, %v28_v19  ;;  %v30_v22 = vld [vmem:[%s289_s1 + $0x70] sm:$0xff]  ;;  %v31_v23 = vld [vmem:[%s289_s1 + $0x78] sm:$0xff]  ;;  %v15_v25 = vld [vmem:[%s290_s0 + $0x8] sm:$0xff] }
   0x7   :  { %v202_v24 = vpack.c.bf16 %v31_v23, %v30_v22  ;;  %v120_v26 = vld [vmem:[%s291_s2] ss:$0 sm:$0xff] }
   0x9   :  { %181 = vmatpush3.bf16.msra.mxu0 %v178_v5 }
   0xa   :  { %183 = vmatprep.subr.bf16.mxu0 %v182_v8 }
   0xd   :  { %185 = vmatpush3.bf16.msra.mxu0 %v182_v8 }
   0xe   :  { %187 = vmatprep.subr.bf16.mxu0 %v186_v12 }
  0x11   :  { %189 = vmatpush3.bf16.msra.mxu0 %v186_v12 }
  0x12   :  { %191 = vmatprep.subr.bf16.mxu0 %v190_v15 }
  0x15   :  { %193 = vmatpush3.bf16.msra.mxu0 %v190_v15 }
  0x16   :  { %195 = vmatprep.subr.bf16.mxu0 %v194_v18 }
  0x19   :  { %197 = vmatpush3.bf16.msra.mxu0 %v194_v18 }
  0x1a   :  { %199 = vmatprep.subr.bf16.mxu0 %v198_v21 }
  0x1d   :  { %201 = vmatpush3.bf16.msra.mxu0 %v198_v21 }
  0x1e   :  { %203 = vmatprep.subr.bf16.mxu0 %v202_v24 }
  0x21   :  { %205 = vmatpush3.bf16.msra.mxu0 %v202_v24 }
  0x24   :  { %172 = vmatmul.mubr.f32.vlgmr.msra.gmra.mrb[0].mxu0 %v15_v25 }
  0xf7   :  { %v173_v27 = vpop.f32.mrb[0].mxu0 }
  0xf8   :  { %v111_v28 = vadd.f32 %v173_v27, %v120_v26  ;;  %v105_v29 = vpop.f32.mrb[1].mxu0 }
  0xf9   :  { %v106_v30 = vadd.f32 %v120_v26, %v105_v29 }
  0xfa   :  { %115 = vst [vmem:[%s292_s3 + $0x8] sm:$0xff] %v111_v28 }
  0xfb   :  { %114 = vst [vmem:[%s292_s3] sm:$0xff] %v106_v30 }

</bundles_post_ra>
